<compile_context>
chip_gen: v7x
topology: tpu7x:2x2x1
jax: 0.10.0
libtpu: 0.0.40
codegen_flags: <defaults>
</compile_context>

<pallas_src>
import functools
import math

import jax
import jax.numpy as jnp
from jax.experimental import pallas as pl
from jax.experimental.pallas import tpu as pltpu


# ---------------------------------------------------------------------------
# VMEM-capacity helpers (generation-aware tiling)
# ---------------------------------------------------------------------------
def _vmem_capacity_bytes():
    try:
        cap = getattr(pltpu.get_tpu_info(), "vmem_capacity_bytes", None)
        if cap:
            return int(cap)
    except Exception:
        pass
    return 64 * 1024 * 1024  # conservative default (v7x per-TensorCore)


def _vmem_budget_bytes():
    # Working-set budget for tile selection: half of physical VMEM, capped.
    # v5e/v6e (128 MiB) -> 64 MiB;  v7x (64 MiB per TC) -> 32 MiB.
    return min(_vmem_capacity_bytes() // 2, 72 * 1024 * 1024)


def _pick_tq(n, c, budget_bytes):
    """Query-row tile: large, multiple of 128 (lane-friendly), divides N,
    keeps >= 2 tiles (megacore), working set within the VMEM budget."""
    fixed = 2 * (c * n * 2) + 2 * 4 * (c * c + c)        # K bf16 (x2 bufs) + weights

    def per_step(tq):
        return (2 * tq * c * 4      # x query tile f32, double-buffered
                + 2 * tq * n * 2    # bf16 output tile, double-buffered
                + 3 * tq * n * 4    # f32 softmax temporaries (s, e, scaled)
                + tq * c * 4)       # qT

    for tq in (2048, 1024, 512, 256, 128):
        if tq < n and n % tq == 0 and fixed + per_step(tq) <= budget_bytes:
            return tq
    # Fallback: largest multiple-of-8 divisor of N that fits (not a single
    # (N, N) block, which can blow past v7x's 64 MiB at exactly the sizes
    # where tiling matters most).
    start = (min(n - 1, 1024) // 8) * 8
    for tq in range(start, 7, -8):
        if n % tq == 0 and fixed + per_step(tq) <= budget_bytes:
            return tq
    return n  # tiny-N degenerate case


# ---------------------------------------------------------------------------
# Pallas kernel: per (batch, query-tile) Q projection + Q^T K + softmax + /bs^2
# ---------------------------------------------------------------------------
def _attn_kernel(xq_ref, wqt_ref, bq_ref, k_ref, o_ref, *, inv_bs2):
    # xq_ref : (TQ, C) f32  -- query rows of X2^T for this tile
    # wqt_ref: (C, C)  f32  -- (Wq / sqrt(C))^T  (scale folded in wrapper)
    # bq_ref : (1, C)  f32  -- bq / sqrt(C)
    # k_ref  : (C, N)  bf16 -- K = Wk X2 + bk, precomputed once in the wrapper
    # o_ref  : (TQ, N) bf16 -- attention rows (softmaxed, already / bs^2)

    # Canonical (TQ, C) @ (C, C) MXU matmul; bias broadcast over rows.
    qT = jnp.dot(xq_ref[...], wqt_ref[...],
                 preferred_element_type=jnp.float32) + bq_ref[...]      # (TQ, C)

    # Dominant contraction in bf16 (rated MXU path), f32 accumulation.
    s = jnp.dot(qT.astype(jnp.bfloat16), k_ref[...],
                preferred_element_type=jnp.float32)                     # (TQ, N)

    # Exact row softmax (full key axis resident per step), fused with the
    # 1/block_size^2 scale; exact per-row reciprocal (kernel is mem-bound).
    m = jnp.max(s, axis=-1, keepdims=True)
    e = jnp.exp(s - m)
    r = jnp.sum(e, axis=-1, keepdims=True)
    o_ref[...] = (e * (inv_bs2 / r)).astype(o_ref.dtype)


def _attention_pallas(x_nc, wqt, bq_row, k_bf16, *, inv_bs2,
                      out_dtype=jnp.bfloat16):
    B, N, C = x_nc.shape
    tq = _pick_tq(N, C, _vmem_budget_bytes())
    nq = N // tq
    kernel = functools.partial(_attn_kernel, inv_bs2=inv_bs2)

    # Advisory cost estimate (K projection no longer inside the kernel;
    # bf16 K input and bf16 N^2 output).
    flops = 2 * B * N * C * (C + N)
    transcendentals = B * (N * N + N)
    bytes_accessed = B * (4 * N * C + 2 * C * N + 2 * N * N) + 4 * (C * C + C)

    # Scoped-VMEM limit derived from the actual per-step working set, clamped
    # under the physical capacity of the current generation.
    working = (2 * (C * N * 2)            # K bf16, double-buffered
               + 2 * tq * C * 4           # x query tile, double-buffered
               + 2 * tq * N * 2           # bf16 output tile, double-buffered
               + 3 * tq * N * 4           # f32 softmax temporaries
               + tq * C * 4
               + 4 * (C * C + C))
    cap = _vmem_capacity_bytes()
    vmem_limit = max(2 * working, 32 * 1024 * 1024)
    vmem_limit = min(vmem_limit, max(int(0.75 * cap), working + (4 << 20)))
    vmem_limit = int(min(vmem_limit, 112 * 1024 * 1024))

    return pl.pallas_call(
        kernel,
        out_shape=jax.ShapeDtypeStruct((B, N, N), out_dtype),
        grid_spec=pltpu.PrefetchScalarGridSpec(
            num_scalar_prefetch=0,
            grid=(B, nq),
            in_specs=[
                pl.BlockSpec((None, tq, C), lambda b, q: (b, q, 0)),   # X2^T rows
                pl.BlockSpec((C, C), lambda b, q: (0, 0)),             # Wq^T (scaled)
                pl.BlockSpec((1, C), lambda b, q: (0, 0)),             # bq (scaled)
                pl.BlockSpec((None, C, N), lambda b, q: (b, 0, 0)),    # K (bf16)
            ],
            out_specs=pl.BlockSpec((None, tq, N), lambda b, q: (b, q, 0)),
        ),
        compiler_params=pltpu.CompilerParams(
            dimension_semantics=("parallel", "parallel"),
            vmem_limit_bytes=vmem_limit,
        ),
        cost_estimate=pl.CostEstimate(
            flops=flops,
            transcendentals=transcendentals,
            bytes_accessed=bytes_accessed,
        ),
    )(x_nc, wqt, bq_row, k_bf16)


# ---------------------------------------------------------------------------
# Full forward (glue + Pallas hot path), mirroring the PyTorch module
# ---------------------------------------------------------------------------
def coarse_grained_self_attention(x, wq, bq, wk, bk, block_size):
    B, C, H, W = x.shape
    bs = block_size
    Hn, Wn = H // bs, W // bs
    N = H * W

    # exact equivalent of: view -> permute(0,1,3,5,2,4) -> contiguous -> view
    x2 = (
        x.reshape(B, C, Hn, bs, Wn, bs)
         .transpose(0, 1, 3, 5, 2, 4)
         .reshape(B, C, N)
    )                                                     # (B, C, N)

    # K projection (including bias bk) hoisted out of the kernel: computed
    # once per batch in f32 by XLA, then cast once to bf16 for the MXU path.
    k_bf16 = (jnp.einsum("oc,bcn->bon", wk, x2)
              + bk[None, :, None]).astype(jnp.bfloat16)   # (B, C, N)

    # Query side pre-transposed to (B, N, C); 1/sqrt(C) folded into Wq^T / bq
    # so no per-step (TQ, N) scale pass is needed in the kernel.
    x_nc = jnp.transpose(x2, (0, 2, 1))                   # (B, N, C)
    scale = 1.0 / math.sqrt(C)
    wqt = (wq * scale).T                                  # (C, C)
    bq_row = (bq * scale).reshape(1, C)

    attn = _attention_pallas(
        x_nc, wqt, bq_row, k_bf16, inv_bs2=1.0 / (bs * bs),
        out_dtype=jnp.bfloat16,
    )                                                     # (B, N, N) bf16

    # torch: attn_weights.view(B, H_new, W_new, H_new, W_new)
    attn = attn.reshape(B, Hn, Wn, Hn, Wn)

    # TODO(synk): the final broadcasted multiply (4-D x against 5-D attn,
    # right-aligned numpy broadcasting; output shape depends on B/C/H/W) is
    # kept in JAX glue rather than fused into the kernel epilogue.
    return x * attn  # bf16*f32 promotes to f32


# ---------------------------------------------------------------------------
# Pure-JAX reference for verification
# ---------------------------------------------------------------------------
def _reference(x, wq, bq, wk, bk, block_size):
    B, C, H, W = x.shape
    bs = block_size
    Hn, Wn = H // bs, W // bs
    xc = (
        x.reshape(B, C, Hn, bs, Wn, bs)
         .transpose(0, 1, 3, 5, 2, 4)
         .reshape(B, C, Hn * Wn, bs * bs)
    )
    q = jnp.einsum("oc,bcij->boij", wq, xc) + bq[None, :, None, None]
    k = jnp.einsum("oc,bcij->boij", wk, xc) + bk[None, :, None, None]
    qf = q.reshape(B, C, -1)
    kf = k.reshape(B, C, -1)
    s = jnp.einsum("bcn,bcm->bnm", qf, kf) / (C ** 0.5)
    a = jax.nn.softmax(s, axis=-1)
    a = a.reshape(B, Hn, Wn, Hn, Wn) / (bs ** 2)
    return x * a


if __name__ == "__main__":
    # Shapes chosen so the original PyTorch forward is well-defined:
    # block_size=1 (the .view constraint) and C == W, B == 1 (so the final
    # 4-D x against 5-D attn broadcast is legal).  N = H*W = 512 -> TQ = 256,
    # grid (1, 2): exercises the tiled query path.
    B, C, H, W = 1, 32, 16, 32
    block_size = 1

    key = jax.random.PRNGKey(0)
    kx, kwq, kbq, kwk, kbk = jax.random.split(key, 5)
    x = jax.random.normal(kx, (B, C, H, W), jnp.float32)
    # Conv2d(C, C, 1): weight (C, C, 1, 1) -> (C, C), bias (C,)
    wq = jax.random.normal(kwq, (C, C), jnp.float32) * 0.1
    bq = jax.random.normal(kbq, (C,), jnp.float32) * 0.1
    wk = jax.random.normal(kwk, (C, C), jnp.float32) * 0.1
    bk = jax.random.normal(kbk, (C,), jnp.float32) * 0.1

    out = jax.block_until_ready(
        coarse_grained_self_attention(x, wq, bq, wk, bk, block_size))
    ref = jax.block_until_ready(_reference(x, wq, bq, wk, bk, block_size))

    assert out.shape == ref.shape, (out.shape, ref.shape)
    # Tolerance-based check: bf16 score matmul + bf16 attention output make
    # the result bit-different but numerically close (~1% relative).
    max_err = float(jnp.max(jnp.abs(out - ref)))
    assert bool(jnp.allclose(out, ref, rtol=3e-2, atol=3e-3)), \
        f"max abs err {max_err}"

    print("KERNEL_OK")
</pallas_src>

<mosaic_0001>
module attributes {stable_mosaic.version = 11 : i64} {
  func.func @_attn_kernel(%arg0: i32, %arg1: i32, %arg2: memref<1x256x32xf32, #tpu.memory_space<vmem>>, %arg3: memref<32x32xf32, #tpu.memory_space<vmem>>, %arg4: memref<1x32xf32, #tpu.memory_space<vmem>>, %arg5: memref<1x32x512xbf16, #tpu.memory_space<vmem>>, %arg6: memref<1x256x512xbf16, #tpu.memory_space<vmem>>) attributes {dimension_semantics = [#tpu.dimension_semantics<parallel>, #tpu.dimension_semantics<parallel>], iteration_bounds = array<i64: 1, 2>, scalar_prefetch = 0 : i64, scratch_operands = 0 : i64, tpu.core_type = #tpu.core_type<tc>, window_params = [{transform_indices = @transform_0, window_bounds = array<i64: 1, 256, 32>}, {pipeline_mode = #tpu.pipeline_mode<synchronous>, transform_indices = @transform_1, window_bounds = array<i64: 32, 32>}, {pipeline_mode = #tpu.pipeline_mode<synchronous>, transform_indices = @transform_2, window_bounds = array<i64: 1, 32>}, {transform_indices = @transform_3, window_bounds = array<i64: 1, 32, 512>}, {transform_indices = @transform_4, window_bounds = array<i64: 1, 256, 512>}]} {
    %c0 = arith.constant 0 : index
    %c0_0 = arith.constant 0 : index
    %c0_1 = arith.constant 0 : index
    %0 = vector.load %arg2[%c0, %c0_0, %c0_1] : memref<1x256x32xf32, #tpu.memory_space<vmem>>, vector<1x256x32xf32>
    %1 = vector.shape_cast %0 : vector<1x256x32xf32> to vector<256x32xf32>
    %c0_2 = arith.constant 0 : index
    %c0_3 = arith.constant 0 : index
    %2 = vector.load %arg3[%c0_2, %c0_3] : memref<32x32xf32, #tpu.memory_space<vmem>>, vector<32x32xf32>
    %cst = arith.constant dense<0.000000e+00> : vector<256x32xf32>
    %3 = tpu.matmul %1, %2, %cst {dimension_numbers = #tpu.dot_dimension_numbers<[1], [0], [0], [1], [0, 0, 1, 1], [], []>} : vector<256x32xf32>, vector<32x32xf32>, vector<256x32xf32> -> vector<256x32xf32>
    %c0_4 = arith.constant 0 : index
    %c0_5 = arith.constant 0 : index
    %4 = vector.load %arg4[%c0_4, %c0_5] : memref<1x32xf32, #tpu.memory_space<vmem>>, vector<1x32xf32>
    %5 = vector.broadcast %4 : vector<1x32xf32> to vector<256x32xf32>
    %6 = arith.addf %3, %5 : vector<256x32xf32>
    %7 = arith.truncf %6 : vector<256x32xf32> to vector<256x32xbf16>
    %c0_6 = arith.constant 0 : index
    %c0_7 = arith.constant 0 : index
    %c0_8 = arith.constant 0 : index
    %8 = vector.load %arg5[%c0_6, %c0_7, %c0_8] : memref<1x32x512xbf16, #tpu.memory_space<vmem>>, vector<1x32x512xbf16>
    %9 = vector.shape_cast %8 : vector<1x32x512xbf16> to vector<32x512xbf16>
    %cst_9 = arith.constant dense<0.000000e+00> : vector<256x512xf32>
    %10 = tpu.matmul %7, %9, %cst_9 {dimension_numbers = #tpu.dot_dimension_numbers<[1], [0], [0], [1], [0, 0, 1, 1], [], []>} : vector<256x32xbf16>, vector<32x512xbf16>, vector<256x512xf32> -> vector<256x512xf32>
    %cst_10 = arith.constant dense<0xFF800000> : vector<256xf32>
    %11 = vector.multi_reduction <maximumf>, %10, %cst_10 [1] : vector<256x512xf32> to vector<256xf32>
    %12 = vector.shape_cast %11 : vector<256xf32> to vector<256x1xf32>
    %13 = vector.broadcast %12 : vector<256x1xf32> to vector<256x512xf32>
    %14 = arith.subf %10, %13 : vector<256x512xf32>
    %15 = math.exp %14 : vector<256x512xf32>
    %cst_11 = arith.constant dense<0.000000e+00> : vector<256xf32>
    %16 = vector.multi_reduction <add>, %15, %cst_11 [1] : vector<256x512xf32> to vector<256xf32>
    %17 = vector.shape_cast %16 : vector<256xf32> to vector<256x1xf32>
    %cst_12 = arith.constant 1.000000e+00 : f32
    %18 = vector.broadcast %cst_12 : f32 to vector<256x1xf32>
    %19 = arith.divf %18, %17 : vector<256x1xf32>
    %20 = vector.broadcast %19 : vector<256x1xf32> to vector<256x512xf32>
    %21 = arith.mulf %15, %20 : vector<256x512xf32>
    %22 = arith.truncf %21 : vector<256x512xf32> to vector<256x512xbf16>
    %c0_13 = arith.constant 0 : index
    %c0_14 = arith.constant 0 : index
    %c0_15 = arith.constant 0 : index
    %23 = vector.load %arg6[%c0_13, %c0_14, %c0_15] : memref<1x256x512xbf16, #tpu.memory_space<vmem>>, vector<1x256x512xbf16>
    %24 = vector.shape_cast %23 : vector<1x256x512xbf16> to vector<256x512xbf16>
    %25 = vector.shape_cast %22 : vector<256x512xbf16> to vector<1x256x512xbf16>
    tpu.vector_store %arg6[%c0_13, %c0_14, %c0_15], %25 {strides = array<i32>} : memref<1x256x512xbf16, #tpu.memory_space<vmem>>, vector<1x256x512xbf16>,
    return
  }
  func.func @transform_0(%arg0: i32, %arg1: i32) -> (i32, i32, i32) {
    %c0_i32 = arith.constant 0 : i32
    %c0_i32_0 = arith.constant 0 : i32
    return %arg0, %arg1, %c0_i32 : i32, i32, i32
  }
  func.func @transform_1(%arg0: i32, %arg1: i32) -> (i32, i32) {
    %c0_i32 = arith.constant 0 : i32
    %c0_i32_0 = arith.constant 0 : i32
    %c0_i32_1 = arith.constant 0 : i32
    return %c0_i32, %c0_i32_0 : i32, i32
  }
  func.func @transform_2(%arg0: i32, %arg1: i32) -> (i32, i32) {
    %c0_i32 = arith.constant 0 : i32
    %c0_i32_0 = arith.constant 0 : i32
    %c0_i32_1 = arith.constant 0 : i32
    return %c0_i32, %c0_i32_0 : i32, i32
  }
  func.func @transform_3(%arg0: i32, %arg1: i32) -> (i32, i32, i32) {
    %c0_i32 = arith.constant 0 : i32
    %c0_i32_0 = arith.constant 0 : i32
    %c0_i32_1 = arith.constant 0 : i32
    return %arg0, %c0_i32, %c0_i32_0 : i32, i32, i32
  }
  func.func @transform_4(%arg0: i32, %arg1: i32) -> (i32, i32, i32) {
    %c0_i32 = arith.constant 0 : i32
    %c0_i32_0 = arith.constant 0 : i32
    return %arg0, %arg1, %c0_i32 : i32, i32, i32
  }
}

</mosaic_0001>

<bundles_post_ra>
// kernel: tpu_custom_call.1
= control target key start
LH: loop header
LB: loop body
LE: loop exit
PB: predicated region body
PF: predicated region fallthrough
CT: control target
= control target key end

     0   :  { %9 = vsyncpa [#allocation3], 0  ;;  %s4819_s0 = inlined_call_operand.vmem [shape: f32[1,512,32], index: 0, kind: input, shape index: {}]   ;;  %s4820_s1 = inlined_call_operand.vmem [shape: f32[32,32], index: 1, kind: input, shape index: {}]   ;;  %s4821_s2 = inlined_call_operand.vmem [shape: f32[1,32], index: 2, kind: input, shape index: {}]   ;;  %s4822_s3 = inlined_call_operand.vmem [shape: bf16[1,32,512], index: 3, kind: input, shape index: {}]   ;;  %s4823_s4 = inlined_call_operand.hbm [shape: bf16[1,512,512], index: 4, kind: output, shape index: {}]  }
   0x1   :  { %11 = vsyncpa [#allocation3 + $0x1], 0  ;;  %s3387_s15 = smov 0   ;;  %s3389_s16 = smov 0  }
   0x2   :  { %s3391_s17 = smov 0   ;;  %s3393_s18 = smov 0  }
   0x3   :  { %s3395_s19 = smov 0   ;;  %s3397_s20 = smov 0  }
   0x4 LB: > { %s2566_s21 = sadd.s32 4294967295, %s3356_s20   ;;  %s2567_s22 = sadd.s32 4294967294, %s3356_s20   ;;  %s3356_s20 = sphi %s3397_s20, %s17_s20   ;;  %s3352_s19 = sphi %s3395_s19, %s5295_s19   ;;  %s3348_s18 = sphi %s3393_s18, %s5294_s18   ;;  %s3344_s17 = sphi %s3391_s17, %s5293_s17   ;;  %s3340_s16 = sphi %s3389_s16, %s5292_s16   ;;  %s3336_s15 = sphi %s3387_s15, %s5291_s15  }
   0x5   : > { %s26_s23 = sadd.s32 1, %s3352_s19  ;;  %s134_s24 = sadd.s32 1, %s3344_s17 }
   0x6   : > { %p27_p0 = scmp.ge.s32.totalorder %s26_s23, 2  ;;  %p144_p1 = scmp.ne.s32.totalorder %s3344_s17, %s3340_s16 }
   0x7   : > { %p145_p2 = scmp.eq.s32.totalorder %s2566_s21, 1  ;;  %p150_p3 = scmp.ne.s32.totalorder %s3340_s16, %s3336_s15 }
   0x8   : > { %s5297_s23 = smov (%p27_p0, %s26_s23), 0  ;;  %p151_p5 = scmp.eq.s32.totalorder %s2567_s22, 1 }
   0x9   : > { %p3427_p4 = por %p145_p2, %p144_p1  ;;  %s130_s26 = ssub.s32 %s3352_s19, %s5297_s23 }
   0xa   : > { %p2571_p6 = scmp.ge.s32.totalorder %s3356_s20, 1  ;;  %p132_p7 = scmp.eq.s32.totalorder %s130_s26, 0 }
   0xb   : > { %p3434_p8 = por %p151_p5, %p150_p3  ;;  %p196_p9 = scmp.lt.s32.totalorder %s3356_s20, 3 }
   0xc   : > { %s3440_s28 = scalar_select %p132_p7, %s3344_s17, %s134_s24  }
   0xd   : > { %p197_p10 = pnand %p2571_p6, %p196_p9 }
   0xf   : > { %200 = sbr.rel (%p197_p10) target bundleno = 929 (0x3a1), region = 36 }
  0x16   : > { %v280_v0 = vld [vmem:[%s4820_s1] sm:$0xff]  ;;  %v281_v1 = vld [vmem:[%s4820_s1 + $0x8] sm:$0xff]  ;;  %v282_v2 = vld [vmem:[%s4820_s1 + $0x10] sm:$0xff]  ;;  %s2573_s9 = sshll.u32 %s3348_s18, 5  ;;  %vm291_vm0 = vcmask 261120   ;;  %v3358_v46 = vmov 0  }
  0x17   : > { %v2876_v3 = vpack.c.bf16 %v281_v1, %v280_v0  ;;  %v283_v4 = vld [vmem:[%s4820_s1 + $0x18] sm:$0xff]  ;;  %p234_p11 = scmp.lt.s32.totalorder %s2573_s9, 63  ;;  %v2948_v7 = vld [vmem:[%s4822_s3 + $0x4] ss:$16 sps:$4 sm:$0xff]   ;;  %v2946_v13 = vld [vmem:[%s4822_s3] ss:$16 sps:$4 sm:$0xff]  }
  0x18   : > { %v2880_v5 = vpack.c.bf16 %v283_v4, %v282_v2  ;;  %v2951_v6 = vld [vmem:[%s4822_s3 + $0xc] ss:$16 sps:$4 sm:$0xff]   ;;  %v2949_v10 = vld [vmem:[%s4822_s3 + $0x8] ss:$16 sps:$4 sm:$0xff]   ;;  %v2954_v14 = vld [vmem:[%s4822_s3 + $0x24] ss:$16 sps:$4 sm:$0xff]  }
  0x19   : > { %2877 = vmatprep.subr.bf16.mxu0 %v2876_v3  ;;  %s5299_s9 = smov (!%p234_p11, %s2573_s9), 63  ;;  %2884 = vmatprep.subr.bf16.mxu1 %v2876_v3  ;;  %v2957_v12 = vld [vmem:[%s4822_s3 + $0x2c] ss:$16 sps:$4 sm:$0xff]   ;;  %v2955_v20 = vld [vmem:[%s4822_s3 + $0x28] ss:$16 sps:$4 sm:$0xff]   ;;  %s2783_s5 = sshll.u32 %s3348_s18, 13 }
  0x1a   : > { %2879 = vmatpush3.bf16.msra.mxu0 %v2876_v3  ;;  %2886 = vmatpush3.bf16.msra.mxu1 %v2876_v3  ;;  %s2574_s12 = sshll.u32 %s5299_s9, 3  ;;  %v2952_v24 = vld [vmem:[%s4822_s3 + $0x20] ss:$16 sps:$4 sm:$0xff]   ;;  %s4765_s9 = scalar_lea.hbm %s4823_s4, %s2783_s5 }
  0x1b   : > { %2881 = vmatprep.subr.bf16.mxu0 %v2880_v5  ;;  %2885 = vmatprep.subr.bf16.mxu1 %v2880_v5  ;;  %s3461_s24 = scalar_lea.vmem %s4819_s0, %s2574_s12  ;;  %v3553_v47 = vld [vmem:[%s4821_s2] ss:$0 sm:$0xff]  ;;  %s3359_s11 = smov [#allocation2]  }
  0x1c   : > { %v248_v8 = vld [vmem:[%s3461_s24] sm:$0xff]  ;;  %v249_v9 = vld [vmem:[%s3461_s24 + $0x8] sm:$0xff]  ;;  %v250_v11 = vld [vmem:[%s3461_s24 + $0x10] sm:$0xff]  ;;  %s3282_s12 = sshll.u32 %s3359_s11, 4  ;;  %s3283_s12 = int_to_ptr.vmem [resolvable:$false] %s3282_s12 }
  0x1d   : > { %2828 = vmatprep.mubr.msk.f32.mxu0 %vm291_vm0, %v248_v8  ;;  %v251_v15 = vld [vmem:[%s3461_s24 + $0x18] sm:$0xff]  ;;  %v264_v16 = vld [vmem:[%s3461_s24 + $0x80] sm:$0xff]  ;;  %v265_v17 = vld [vmem:[%s3461_s24 + $0x88] sm:$0xff]  ;;  %s3284_s13 = scalar_lea.vmem %s3283_s12, 16384 }
  0x1e   : > { %2883 = vmatpush3.bf16.msra.mxu0 %v2880_v5  ;;  %2887 = vmatpush3.bf16.msra.mxu1 %v2880_v5  ;;  %v252_v18 = vld [vmem:[%s3461_s24 + $0x20] sm:$0xff]  ;;  %v266_v19 = vld [vmem:[%s3461_s24 + $0x90] sm:$0xff]  ;;  %v267_v21 = vld [vmem:[%s3461_s24 + $0x98] sm:$0xff] }
  0x1f   : > { %918 = vmatprep.subr.bf16.mxu0 %v2951_v6  ;;  %725 = vmatprep.subr.bf16.mxu1 %v2948_v7  ;;  %v253_v22 = vld [vmem:[%s3461_s24 + $0x28] sm:$0xff]  ;;  %v268_v23 = vld [vmem:[%s3461_s24 + $0xa0] sm:$0xff]  ;;  %v254_v25 = vld [vmem:[%s3461_s24 + $0x30] sm:$0xff] }
  0x20   : > { %2852 = vmatprep.mubr.msk.f32.mxu1 %vm291_vm0, %v264_v16  ;;  %v269_v26 = vld [vmem:[%s3461_s24 + $0xa8] sm:$0xff]  ;;  %v255_v27 = vld [vmem:[%s3461_s24 + $0x38] sm:$0xff]  ;;  %v270_v28 = vld [vmem:[%s3461_s24 + $0xb0] sm:$0xff] }
  0x21   : > { %2829 = vmatmul.mubr.msk.f32.vlgmr.msra.gmra.mrb[0].mxu0 %vm291_vm0, %v249_v9  ;;  %2853 = vmatmul.mubr.msk.f32.vlgmr.msra.gmra.mrb[0].mxu1 %vm291_vm0, %v265_v17  ;;  %v256_v29 = vld [vmem:[%s3461_s24 + $0x40] sm:$0xff]  ;;  %v271_v30 = vld [vmem:[%s3461_s24 + $0xb8] sm:$0xff]  ;;  %v257_v31 = vld [vmem:[%s3461_s24 + $0x48] sm:$0xff] }
  0x22   : > { %2831 = vmatprep.mubr.msk.f32.mxu0 %vm291_vm0, %v250_v11  ;;  %919 = vmatpush1.bf16.msra.mxu0 %v2949_v10  ;;  %v272_v32 = vld [vmem:[%s3461_s24 + $0xc0] sm:$0xff]  ;;  %v258_v33 = vld [vmem:[%s3461_s24 + $0x50] sm:$0xff]  ;;  %v273_v34 = vld [vmem:[%s3461_s24 + $0xc8] sm:$0xff] }
  0x23   : > { %920 = vmatprep.subr.bf16.mxu0 %v2957_v12  ;;  %2855 = vmatprep.mubr.msk.f32.mxu1 %vm291_vm0, %v266_v19  ;;  %v259_v35 = vld [vmem:[%s3461_s24 + $0x58] sm:$0xff]  ;;  %v274_v36 = vld [vmem:[%s3461_s24 + $0xd0] sm:$0xff]  ;;  %v260_v37 = vld [vmem:[%s3461_s24 + $0x60] sm:$0xff] }
  0x24   : > { %726 = vmatpush1.bf16.msra.mxu1 %v2946_v13  ;;  %v275_v38 = vld [vmem:[%s3461_s24 + $0xd8] sm:$0xff]  ;;  %v261_v39 = vld [vmem:[%s3461_s24 + $0x68] sm:$0xff]  ;;  %v276_v40 = vld [vmem:[%s3461_s24 + $0xe0] sm:$0xff] }
  0x25   : > { %2832 = vmatmul.mubr.msk.f32.gmra.mrb[2].mxu0 %vm291_vm0, %v251_v15  ;;  %727 = vmatprep.subr.bf16.mxu1 %v2954_v14  ;;  %v262_v41 = vld [vmem:[%s3461_s24 + $0x70] sm:$0xff]  ;;  %v277_v42 = vld [vmem:[%s3461_s24 + $0xe8] sm:$0xff]  ;;  %v263_v43 = vld [vmem:[%s3461_s24 + $0x78] sm:$0xff] }
  0x26   : > { %2834 = vmatprep.mubr.msk.f32.mxu0 %vm291_vm0, %v252_v18  ;;  %921 = vmatpush1.bf16.msra.mxu0 %v2955_v20  ;;  %v278_v44 = vld [vmem:[%s3461_s24 + $0xf0] sm:$0xff]  ;;  %v279_v45 = vld [vmem:[%s3461_s24 + $0xf8] sm:$0xff]  ;;  %s228_s24 = sand.u32 1, %s3340_s16  }
  0x27   : > { %2856 = vmatmul.mubr.msk.f32.gmra.mrb[2].mxu1 %vm291_vm0, %v267_v21  ;;  %s2572_s29 = sshll.u32 %s228_s24, 9  ;;  %s4773_s18 = scalar_lea.sflag [#allocation3], %s228_s24 }
  0x28   : > { %2858 = vmatprep.mubr.msk.f32.mxu1 %vm291_vm0, %v268_v23  ;;  %728 = vmatpush1.bf16.msra.mxu1 %v2952_v24  ;;  %s4576_s30 = scalar_lea.vmem [#allocation2], %s2572_s29 }
  0x29   : > { %2835 = vmatmul.mubr.msk.f32.gmra.mrb[4].mxu0 %vm291_vm0, %v253_v22  ;;  %s2472_s6 = sshll.u32 %s4576_s30, 4  ;;  %s4767_s6 = int_to_ptr.vmem [resolvable:$true] %s2472_s6 }
  0x2a   : > { %2837 = vmatprep.mubr.msk.f32.mxu0 %vm291_vm0, %v254_v25  ;;  %s3278_s10 = scalar_lea.vmem %s4767_s6, 8192  ;;  %p3285_p1 = scmp.lt.s32.totalorder %s4767_s6, %s3283_s12 }
  0x2b   : > { %2859 = vmatmul.mubr.msk.f32.gmra.mrb[4].mxu1 %vm291_vm0, %v269_v26  ;;  %p3279_p12 = scmp.ne.s32.totalorder %s4767_s6, %s3278_s10  ;;  %p3286_p2 = scmp.lt.s32.totalorder %s3284_s13, %s3278_s10 }
  0x2c   : > { %2861 = vmatprep.mubr.msk.f32.mxu1 %vm291_vm0, %v270_v28 }
  0x2d   : > { %2838 = vmatmul.mubr.msk.f32.gmra.mrb[6].mxu0 %vm291_vm0, %v255_v27  ;;  %p3280_p13 = pnand %p3279_p12, %p3427_p4  ;;  %p3287_p3 = por %p3286_p2, %p3285_p1 }
  0x2e   : > { %2840 = vmatprep.mubr.msk.f32.mxu0 %vm291_vm0, %v256_v29 }
  0x2f   : > { %2862 = vmatmul.mubr.msk.f32.gmra.mrb[6].mxu1 %vm291_vm0, %v271_v30  ;;  %p3281_p0 = pneg %p3280_p13 }
  0x30   : > { %2864 = vmatprep.mubr.msk.f32.mxu1 %vm291_vm0, %v272_v32 }
  0x31   : > { %2841 = vmatmul.mubr.msk.f32.gmra.mrb[8].mxu0 %vm291_vm0, %v257_v31  ;;  %p3288_p5 = pnand %p3287_p3, %p3281_p0 }
  0x32   : > { %2843 = vmatprep.mubr.msk.f32.mxu0 %vm291_vm0, %v258_v33 }
  0x33   : > { %2865 = vmatmul.mubr.msk.f32.gmra.mrb[8].mxu1 %vm291_vm0, %v273_v34 }
  0x34   : > { %2867 = vmatprep.mubr.msk.f32.mxu1 %vm291_vm0, %v274_v36 }
  0x35   : > { %2844 = vmatmul.mubr.msk.f32.gmra.mrb[10].mxu0 %vm291_vm0, %v259_v35 }
  0x36   : > { %2846 = vmatprep.mubr.msk.f32.mxu0 %vm291_vm0, %v260_v37 }
  0x37   : > { %2868 = vmatmul.mubr.msk.f32.gmra.mrb[10].mxu1 %vm291_vm0, %v275_v38 }
  0x38   : > { %2870 = vmatprep.mubr.msk.f32.mxu1 %vm291_vm0, %v276_v40 }
  0x39   : > { %2847 = vmatmul.mubr.msk.f32.gmra.mrb[12].mxu0 %vm291_vm0, %v261_v39 }
  0x3a   : > { %2849 = vmatprep.mubr.msk.f32.mxu0 %vm291_vm0, %v262_v41 }
  0x3b   : > { %2871 = vmatmul.mubr.msk.f32.gmra.mrb[12].mxu1 %vm291_vm0, %v277_v42 }
  0x3c   : > { %2873 = vmatprep.mubr.msk.f32.mxu1 %vm291_vm0, %v278_v44 }
  0x3d   : > { %2850 = vmatmul.mubr.msk.f32.gmra.mrb[14].mxu0 %vm291_vm0, %v263_v43 }
  0x3e   : > { %950 = vmatprep.mubr.bf16.mxu0 %v3358_v46 }
  0x3f   : > { %2874 = vmatmul.mubr.msk.f32.gmra.mrb[14].mxu1 %vm291_vm0, %v279_v45 }
  0x40   : > { %757 = vmatprep.mubr.bf16.mxu1 %v3358_v46 }
  0xf4   : > { %v2830_v48 = vpop.f32.mrb[0].mxu0  ;;  %v2854_v52 = vpop.f32.mrb[0].mxu1 }
  0xf5   : > { %v460_v49 = vadd.f32 %v2830_v48, %v3553_v47  ;;  %v454_v50 = vpop.f32.mrb[1].mxu0  ;;  %v540_v55 = vadd.f32 %v2854_v52, %v3553_v47  ;;  %v534_v56 = vpop.f32.mrb[1].mxu1 }
  0xf6   : > { %v455_v51 = vadd.f32 %v3553_v47, %v454_v50  ;;  %v535_v59 = vadd.f32 %v3553_v47, %v534_v56 }
  0xf8   : > { %v613_v53 = vpack.c.bf16 %v460_v49, %v455_v51  ;;  %v2833_v54 = vpop.f32.mrb[2].mxu0  ;;  %v3565_v61 = vpack.c.bf16 %v540_v55, %v535_v59 }
  0xf9   : > { %v470_v57 = vadd.f32 %v2833_v54, %v3553_v47  ;;  %v464_v58 = vpop.f32.mrb[3].mxu0 }
  0xfa   : > { %2616 = vmatmul.mubr.msk.bf16.vlgmr.msra.gmra.mrb[16].mxu1 %vm291_vm0, %v613_v53  ;;  %2632 = vmatmul.mubr.msk.bf16.vlgmr.msra.gmra.mrb[16].mxu0 %vm291_vm0, %v613_v53  ;;  %v465_v60 = vadd.f32 %v3553_v47, %v464_v58  ;;  %v2857_v62 = vpop.f32.mrb[2].mxu1 }
  0xfb   : > { %767 = vmatprep.mubr.bf16.mxu1 %v3358_v46  ;;  %960 = vmatprep.mubr.bf16.mxu0 %v3358_v46  ;;  %v550_v1 = vadd.f32 %v2857_v62, %v3553_v47  ;;  %v544_v2 = vpop.f32.mrb[3].mxu1 }
  0xfc   : > { %v614_v63 = vpack.c.bf16 %v470_v57, %v465_v60  ;;  %v2836_v0 = vpop.f32.mrb[4].mxu0  ;;  %v545_v5 = vadd.f32 %v3553_v47, %v544_v2 }
  0xfd   : > { %v480_v3 = vadd.f32 %v2836_v0, %v3553_v47  ;;  %v474_v4 = vpop.f32.mrb[5].mxu0 }
  0xfe   : > { %v475_v6 = vadd.f32 %v3553_v47, %v474_v4  ;;  %v3571_v7 = vpack.c.bf16 %v550_v1, %v545_v5  ;;  %v2860_v8 = vpop.f32.mrb[4].mxu1 }
  0xff   : > { %v560_v11 = vadd.f32 %v2860_v8, %v3553_v47  ;;  %v554_v12 = vpop.f32.mrb[5].mxu1 }
 0x100   : > { %v615_v9 = vpack.c.bf16 %v480_v3, %v475_v6  ;;  %v2839_v10 = vpop.f32.mrb[6].mxu0  ;;  %v555_v15 = vadd.f32 %v3553_v47, %v554_v12 }
 0x101   : > { %v490_v13 = vadd.f32 %v2839_v10, %v3553_v47  ;;  %v484_v14 = vpop.f32.mrb[7].mxu0 }
 0x102   : > { %2617 = vmatmul.mubr.msk.bf16.gmra.mrb[20].mxu1 %vm291_vm0, %v614_v63  ;;  %2633 = vmatmul.mubr.msk.bf16.gmra.mrb[20].mxu0 %vm291_vm0, %v614_v63  ;;  %v485_v16 = vadd.f32 %v3553_v47, %v484_v14  ;;  %v3581_v17 = vpack.c.bf16 %v560_v11, %v555_v15  ;;  %v2863_v18 = vpop.f32.mrb[6].mxu1 }
 0x103   : > { %777 = vmatprep.mubr.bf16.mxu1 %v3358_v46  ;;  %970 = vmatprep.mubr.bf16.mxu0 %v3358_v46  ;;  %v570_v21 = vadd.f32 %v2863_v18, %v3553_v47  ;;  %v564_v22 = vpop.f32.mrb[7].mxu1 }
 0x104   : > { %v616_v19 = vpack.c.bf16 %v490_v13, %v485_v16  ;;  %v2842_v20 = vpop.f32.mrb[8].mxu0  ;;  %v565_v25 = vadd.f32 %v3553_v47, %v564_v22 }
 0x105   : > { %v500_v23 = vadd.f32 %v2842_v20, %v3553_v47  ;;  %v494_v24 = vpop.f32.mrb[9].mxu0 }
 0x106   : > { %v495_v26 = vadd.f32 %v3553_v47, %v494_v24  ;;  %v3587_v27 = vpack.c.bf16 %v570_v21, %v565_v25  ;;  %v2866_v28 = vpop.f32.mrb[8].mxu1 }
 0x107   : > { %v580_v31 = vadd.f32 %v2866_v28, %v3553_v47  ;;  %v574_v32 = vpop.f32.mrb[9].mxu1 }
 0x108   : > { %v617_v29 = vpack.c.bf16 %v500_v23, %v495_v26  ;;  %v2845_v30 = vpop.f32.mrb[10].mxu0  ;;  %v575_v35 = vadd.f32 %v3553_v47, %v574_v32 }
 0x109   : > { %v510_v33 = vadd.f32 %v2845_v30, %v3553_v47  ;;  %v504_v34 = vpop.f32.mrb[11].mxu0 }
 0x10a   : > { %2618 = vmatmul.mubr.msk.bf16.gmra.mrb[24].mxu1 %vm291_vm0, %v615_v9  ;;  %2634 = vmatmul.mubr.msk.bf16.gmra.mrb[24].mxu0 %vm291_vm0, %v615_v9  ;;  %v505_v36 = vadd.f32 %v3553_v47, %v504_v34  ;;  %v3597_v37 = vpack.c.bf16 %v580_v31, %v575_v35  ;;  %v2869_v38 = vpop.f32.mrb[10].mxu1 }
 0x10b   : > { %787 = vmatprep.mubr.bf16.mxu1 %v3358_v46  ;;  %980 = vmatprep.mubr.bf16.mxu0 %v3358_v46  ;;  %v590_v41 = vadd.f32 %v2869_v38, %v3553_v47  ;;  %v584_v42 = vpop.f32.mrb[11].mxu1 }
 0x10c   : > { %v618_v39 = vpack.c.bf16 %v510_v33, %v505_v36  ;;  %v2848_v40 = vpop.f32.mrb[12].mxu0  ;;  %v585_v45 = vadd.f32 %v3553_v47, %v584_v42 }
 0x10d   : > { %v520_v43 = vadd.f32 %v2848_v40, %v3553_v47  ;;  %v514_v44 = vpop.f32.mrb[13].mxu0 }
 0x10e   : > { %v515_v48 = vadd.f32 %v3553_v47, %v514_v44  ;;  %v626_v49 = vpack.c.bf16 %v590_v41, %v585_v45  ;;  %v2872_v50 = vpop.f32.mrb[12].mxu1 }
 0x10f   : > { %v600_v53 = vadd.f32 %v2872_v50, %v3553_v47  ;;  %v594_v54 = vpop.f32.mrb[13].mxu1 }
 0x110   : > { %v619_v51 = vpack.c.bf16 %v520_v43, %v515_v48  ;;  %v2851_v52 = vpop.f32.mrb[14].mxu0  ;;  %v595_v57 = vadd.f32 %v3553_v47, %v594_v54 }
 0x111   : > { %v530_v55 = vadd.f32 %v2851_v52, %v3553_v47  ;;  %v524_v56 = vpop.f32.mrb[15].mxu0 }
 0x112   : > { %2619 = vmatmul.mubr.msk.bf16.gmra.mrb[28].mxu1 %vm291_vm0, %v616_v19  ;;  %2635 = vmatmul.mubr.msk.bf16.gmra.mrb[28].mxu0 %vm291_vm0, %v616_v19  ;;  %v525_v58 = vadd.f32 %v3553_v47, %v524_v56  ;;  %v627_v59 = vpack.c.bf16 %v600_v53, %v595_v57  ;;  %v2875_v60 = vpop.f32.mrb[14].mxu1 }
 0x113   : > { %797 = vmatprep.mubr.bf16.mxu1 %v3358_v46  ;;  %990 = vmatprep.mubr.bf16.mxu0 %v3358_v46  ;;  %v610_v63 = vadd.f32 %v2875_v60, %v3553_v47  ;;  %v604_v0 = vpop.f32.mrb[15].mxu1 }
 0x114   : > { %v620_v62 = vpack.c.bf16 %v530_v55, %v525_v58  ;;  %v605_v1 = vadd.f32 %v3553_v47, %v604_v0 }
 0x116   : > { %v628_v2 = vpack.c.bf16 %v610_v63, %v605_v1 }
 0x11a   : > { %2620 = vmatmul.mubr.msk.bf16.gmra.mrb[32].mxu1 %vm291_vm0, %v617_v29  ;;  %2636 = vmatmul.mubr.msk.bf16.gmra.mrb[32].mxu0 %vm291_vm0, %v617_v29 }
 0x11b   : > { %807 = vmatprep.mubr.bf16.mxu1 %v3358_v46  ;;  %1000 = vmatprep.mubr.bf16.mxu0 %v3358_v46 }
 0x122   : > { %2621 = vmatmul.mubr.msk.bf16.gmra.mrb[36].mxu1 %vm291_vm0, %v618_v39  ;;  %2637 = vmatmul.mubr.msk.bf16.gmra.mrb[36].mxu0 %vm291_vm0, %v618_v39 }
 0x123   : > { %817 = vmatprep.mubr.bf16.mxu1 %v3358_v46  ;;  %1010 = vmatprep.mubr.bf16.mxu0 %v3358_v46 }
 0x12a   : > { %2622 = vmatmul.mubr.msk.bf16.gmra.mrb[40].mxu1 %vm291_vm0, %v619_v51  ;;  %2638 = vmatmul.mubr.msk.bf16.gmra.mrb[40].mxu0 %vm291_vm0, %v619_v51 }
 0x12b   : > { %827 = vmatprep.mubr.bf16.mxu1 %v3358_v46  ;;  %1020 = vmatprep.mubr.bf16.mxu0 %v3358_v46 }
 0x132   : > { %2623 = vmatmul.mubr.msk.bf16.gmra.mrb[44].mxu1 %vm291_vm0, %v620_v62  ;;  %2639 = vmatmul.mubr.msk.bf16.gmra.mrb[44].mxu0 %vm291_vm0, %v620_v62 }
 0x133   : > { %837 = vmatprep.mubr.bf16.mxu1 %v3358_v46  ;;  %1030 = vmatprep.mubr.bf16.mxu0 %v3358_v46 }
 0x13a   : > { %2624 = vmatmul.mubr.msk.bf16.gmra.mrb[48].mxu1 %vm291_vm0, %v3565_v61  ;;  %2640 = vmatmul.mubr.msk.bf16.gmra.mrb[48].mxu0 %vm291_vm0, %v3565_v61 }
 0x13b   : > { %847 = vmatprep.mubr.bf16.mxu1 %v3358_v46  ;;  %1040 = vmatprep.mubr.bf16.mxu0 %v3358_v46 }
 0x142   : > { %2625 = vmatmul.mubr.msk.bf16.gmra.mrb[52].mxu1 %vm291_vm0, %v3571_v7  ;;  %2641 = vmatmul.mubr.msk.bf16.gmra.mrb[52].mxu0 %vm291_vm0, %v3571_v7 }
 0x143   : > { %857 = vmatprep.mubr.bf16.mxu1 %v3358_v46  ;;  %1050 = vmatprep.mubr.bf16.mxu0 %v3358_v46 }
 0x14a   : > { %2626 = vmatmul.mubr.msk.bf16.gmra.mrb[56].mxu1 %vm291_vm0, %v3581_v17  ;;  %2642 = vmatmul.mubr.msk.bf16.gmra.mrb[56].mxu0 %vm291_vm0, %v3581_v17 }
 0x14b   : > { %867 = vmatprep.mubr.bf16.mxu1 %v3358_v46  ;;  %1060 = vmatprep.mubr.bf16.mxu0 %v3358_v46 }
 0x152   : > { %2627 = vmatmul.mubr.msk.bf16.gmra.mrb[60].mxu1 %vm291_vm0, %v3587_v27  ;;  %2643 = vmatmul.mubr.msk.bf16.gmra.mrb[60].mxu0 %vm291_vm0, %v3587_v27 }
 0x153   : > { %877 = vmatprep.mubr.bf16.mxu1 %v3358_v46  ;;  %1070 = vmatprep.mubr.bf16.mxu0 %v3358_v46 }
 0x15a   : > { %2628 = vmatmul.mubr.msk.bf16.gmra.mrb[64].mxu1 %vm291_vm0, %v3597_v37  ;;  %2644 = vmatmul.mubr.msk.bf16.gmra.mrb[64].mxu0 %vm291_vm0, %v3597_v37 }
 0x15b   : > { %887 = vmatprep.mubr.bf16.mxu1 %v3358_v46  ;;  %1080 = vmatprep.mubr.bf16.mxu0 %v3358_v46 }
 0x162   : > { %2629 = vmatmul.mubr.msk.bf16.gmra.mrb[68].mxu1 %vm291_vm0, %v626_v49  ;;  %2645 = vmatmul.mubr.msk.bf16.gmra.mrb[68].mxu0 %vm291_vm0, %v626_v49 }
 0x163   : > { %897 = vmatprep.mubr.bf16.mxu1 %v3358_v46  ;;  %1090 = vmatprep.mubr.bf16.mxu0 %v3358_v46 }
 0x16a   : > { %2630 = vmatmul.mubr.msk.bf16.gmra.mrb[72].mxu1 %vm291_vm0, %v627_v59  ;;  %2646 = vmatmul.mubr.msk.bf16.gmra.mrb[72].mxu0 %vm291_vm0, %v627_v59 }
 0x16b   : > { %907 = vmatprep.mubr.bf16.mxu1 %v3358_v46  ;;  %1100 = vmatprep.mubr.bf16.mxu0 %v3358_v46 }
 0x172   : > { %2631 = vmatmul.mubr.msk.bf16.gmra.mrb[76].mxu1 %vm291_vm0, %v628_v2  ;;  %2647 = vmatmul.mubr.msk.bf16.gmra.mrb[76].mxu0 %vm291_vm0, %v628_v2 }
 0x1cd   : > { %v3669_v47 = vpop.f32.mrb[16].mxu1  ;;  %v3671_v61 = vpop.f32.mrb[16].mxu0 }
 0x1ce   : > { %v3673_v3 = vpop.f32.mrb[17].mxu1  ;;  %v3675_v4 = vpop.f32.mrb[17].mxu0 }
 0x1cf   : > { %v1111_v5 = vmax.f32 %v3669_v47, %v3673_v3  ;;  %v3679_v6 = vpop.f32.mrb[18].mxu1  ;;  %v3681_v7 = vpop.f32.mrb[18].mxu0 }
 0x1d0   : > { %v3683_v46 = vpop.f32.mrb[19].mxu1  ;;  %v3685_v8 = vpop.f32.mrb[19].mxu0 }
 0x1d1   : > { %v1116_v9 = vmax.f32 %v3679_v6, %v3683_v46  ;;  %v1112_v10 = vmax.f32 %v1111_v5, %v3671_v61 }
 0x1d3   : > { %v1113_v11 = vmax.f32 %v1112_v10, %v3675_v4  ;;  %v1117_v12 = vmax.f32 %v1116_v9, %v3681_v7 }
 0x1d5   : > { %v3692_v13 = vpop.f32.mrb[20].mxu0  ;;  %1114 = vmax.xlane.f32.xlu0 %v1113_v11  ;;  %v3694_v14 = vpop.f32.mrb[20].mxu1  ;;  %v1118_v15 = vmax.f32 %v1117_v12, %v3685_v8 }
 0x1d6   : > { %v3697_v16 = vpop.f32.mrb[21].mxu1  ;;  %v3699_v17 = vpop.f32.mrb[21].mxu0 }
 0x1d7   : > { %v1121_v18 = vmax.f32 %v3694_v14, %v3697_v16  ;;  %v3703_v19 = vpop.f32.mrb[22].mxu1  ;;  %v3705_v20 = vpop.f32.mrb[22].mxu0 }
 0x1d8   : > { %v3707_v21 = vpop.f32.mrb[23].mxu1  ;;  %v3709_v22 = vpop.f32.mrb[23].mxu0 }
 0x1d9   : > { %v1126_v23 = vmax.f32 %v3703_v19, %v3707_v21  ;;  %1119 = vmax.xlane.f32.xlu0 %v1118_v15  ;;  %v1122_v24 = vmax.f32 %v1121_v18, %v3692_v13 }
 0x1db   : > { %v1123_v25 = vmax.f32 %v1122_v24, %v3699_v17  ;;  %v1127_v26 = vmax.f32 %v1126_v23, %v3705_v20 }
 0x1dd   : > { %v3716_v27 = vpop.f32.mrb[24].mxu0  ;;  %1124 = vmax.xlane.f32.xlu1 %v1123_v25  ;;  %v3718_v28 = vpop.f32.mrb[24].mxu1  ;;  %v1128_v29 = vmax.f32 %v1127_v26, %v3709_v22 }
 0x1de   : > { %v3721_v30 = vpop.f32.mrb[25].mxu1  ;;  %v3723_v31 = vpop.f32.mrb[25].mxu0 }
 0x1df   : > { %v1131_v32 = vmax.f32 %v3718_v28, %v3721_v30  ;;  %v3727_v33 = vpop.f32.mrb[26].mxu1  ;;  %v3729_v34 = vpop.f32.mrb[26].mxu0 }
 0x1e0   : > { %v3731_v35 = vpop.f32.mrb[27].mxu1  ;;  %v3733_v36 = vpop.f32.mrb[27].mxu0 }
 0x1e1   : > { %v1136_v37 = vmax.f32 %v3727_v33, %v3731_v35  ;;  %1129 = vmax.xlane.f32.xlu1 %v1128_v29  ;;  %v1132_v38 = vmax.f32 %v1131_v32, %v3716_v27 }
 0x1e3   : > { %v1133_v39 = vmax.f32 %v1132_v38, %v3723_v31  ;;  %v1137_v40 = vmax.f32 %v1136_v37, %v3729_v34 }
 0x1e5   : > { %v3740_v41 = vpop.f32.mrb[28].mxu0  ;;  %1134 = vmax.xlane.f32.xlu0 %v1133_v39  ;;  %v3742_v42 = vpop.f32.mrb[28].mxu1  ;;  %v1138_v43 = vmax.f32 %v1137_v40, %v3733_v36 }
 0x1e6   : > { %v3745_v44 = vpop.f32.mrb[29].mxu1  ;;  %v3747_v45 = vpop.f32.mrb[29].mxu0 }
 0x1e7   : > { %v1141_v48 = vmax.f32 %v3742_v42, %v3745_v44  ;;  %v3751_v49 = vpop.f32.mrb[30].mxu0  ;;  %1139 = vmax.xlane.f32.xlu1 %v1138_v43  ;;  %v3753_v50 = vpop.f32.mrb[30].mxu1 }
 0x1e8   : > { %v3755_v51 = vpop.f32.mrb[31].mxu1  ;;  %v3757_v52 = vpop.f32.mrb[31].mxu0 }
 0x1e9   : > { %v1146_v53 = vmax.f32 %v3753_v50, %v3755_v51  ;;  %v1142_v54 = vmax.f32 %v1141_v48, %v3740_v41 }
 0x1eb   : > { %v1143_v55 = vmax.f32 %v1142_v54, %v3747_v45  ;;  %v1147_v56 = vmax.f32 %v1146_v53, %v3751_v49 }
 0x1ed   : > { %v3764_v57 = vpop.f32.mrb[32].mxu0  ;;  %1144 = vmax.xlane.f32.xlu0 %v1143_v55  ;;  %v3766_v58 = vpop.f32.mrb[32].mxu1  ;;  %v1148_v59 = vmax.f32 %v1147_v56, %v3757_v52 }
 0x1ee   : > { %v3769_v60 = vpop.f32.mrb[33].mxu1  ;;  %v3771_v62 = vpop.f32.mrb[33].mxu0 }
 0x1ef   : > { %v1151_v63 = vmax.f32 %v3766_v58, %v3769_v60  ;;  %v3775_v0 = vpop.f32.mrb[34].mxu0  ;;  %1149 = vmax.xlane.f32.xlu1 %v1148_v59  ;;  %v3777_v1 = vpop.f32.mrb[34].mxu1 }
 0x1f0   : > { %v3779_v2 = vpop.f32.mrb[35].mxu1  ;;  %v3781_v5 = vpop.f32.mrb[35].mxu0 }
 0x1f1   : > { %v1156_v9 = vmax.f32 %v3777_v1, %v3779_v2  ;;  %v1152_v10 = vmax.f32 %v1151_v63, %v3764_v57 }
 0x1f3   : > { %v1153_v11 = vmax.f32 %v1152_v10, %v3771_v62  ;;  %v1157_v12 = vmax.f32 %v1156_v9, %v3775_v0 }
 0x1f5   : > { %v3788_v15 = vpop.f32.mrb[36].mxu0  ;;  %1154 = vmax.xlane.f32.xlu0 %v1153_v11  ;;  %v3790_v18 = vpop.f32.mrb[36].mxu1  ;;  %v1158_v23 = vmax.f32 %v1157_v12, %v3781_v5 }
 0x1f6   : > { %v3793_v24 = vpop.f32.mrb[37].mxu1  ;;  %v3795_v25 = vpop.f32.mrb[37].mxu0 }
 0x1f7   : > { %v1161_v26 = vmax.f32 %v3790_v18, %v3793_v24  ;;  %v3799_v29 = vpop.f32.mrb[38].mxu0  ;;  %1159 = vmax.xlane.f32.xlu1 %v1158_v23  ;;  %v3801_v32 = vpop.f32.mrb[38].mxu1 }
 0x1f8   : > { %v3803_v37 = vpop.f32.mrb[39].mxu1  ;;  %v3805_v38 = vpop.f32.mrb[39].mxu0 }
 0x1f9   : > { %4981 = vst [vmem:[#allocation5_spill] sm:$0xff] %v3805_v38  ;;  %v1166_v39 = vmax.f32 %v3801_v32, %v3803_v37  ;;  %v1162_v40 = vmax.f32 %v1161_v26, %v3788_v15 }
 0x1fb   : > { %v1163_v43 = vmax.f32 %v1162_v40, %v3795_v25  ;;  %v1167_v48 = vmax.f32 %v1166_v39, %v3799_v29 }
 0x1fd   : > { %v3812_v53 = vpop.f32.mrb[40].mxu0  ;;  %1164 = vmax.xlane.f32.xlu0 %v1163_v43  ;;  %v3814_v54 = vpop.f32.mrb[40].mxu1  ;;  %v1168_v55 = vmax.f32 %v1167_v48, %v3805_v38 }
 0x1fe   : > { %4982 = vst [vmem:[#allocation6_spill] sm:$0xff] %v3812_v53  ;;  %4983 = vst [vmem:[#allocation7_spill] sm:$0xff] %v3814_v54  ;;  %v3817_v56 = vpop.f32.mrb[41].mxu1  ;;  %v3819_v59 = vpop.f32.mrb[41].mxu0 }
 0x1ff   : > { %4984 = vst [vmem:[#allocation8_spill] sm:$0xff] %v3817_v56  ;;  %4985 = vst [vmem:[#allocation9_spill] sm:$0xff] %v3819_v59  ;;  %v1171_v63 = vmax.f32 %v3814_v54, %v3817_v56  ;;  %v3823_v9 = vpop.f32.mrb[42].mxu0  ;;  %1169 = vmax.xlane.f32.xlu1 %v1168_v55  ;;  %v3825_v10 = vpop.f32.mrb[42].mxu1 }
 0x200   : > { %4986 = vst [vmem:[#allocation10_spill] sm:$0xff] %v3823_v9  ;;  %4987 = vst [vmem:[#allocation11_spill] sm:$0xff] %v3825_v10  ;;  %v3827_v11 = vpop.f32.mrb[43].mxu1  ;;  %v3829_v12 = vpop.f32.mrb[43].mxu0 }
 0x201   : > { %4988 = vst [vmem:[#allocation12_spill] sm:$0xff] %v3827_v11  ;;  %4989 = vst [vmem:[#allocation13_spill] sm:$0xff] %v3829_v12  ;;  %v1176_v23 = vmax.f32 %v3825_v10, %v3827_v11  ;;  %v1172_v26 = vmax.f32 %v1171_v63, %v3812_v53 }
 0x203   : > { %v1173_v39 = vmax.f32 %v1172_v26, %v3819_v59  ;;  %v1177_v40 = vmax.f32 %v1176_v23, %v3823_v9 }
 0x205   : > { %v3836_v43 = vpop.f32.mrb[44].mxu0  ;;  %1174 = vmax.xlane.f32.xlu0 %v1173_v39  ;;  %v3838_v48 = vpop.f32.mrb[44].mxu1  ;;  %v1178_v55 = vmax.f32 %v1177_v40, %v3829_v12 }
 0x206   : > { %4990 = vst [vmem:[#allocation14_spill] sm:$0xff] %v3836_v43  ;;  %4991 = vst [vmem:[#allocation15_spill] sm:$0xff] %v3838_v48  ;;  %v3841_v56 = vpop.f32.mrb[45].mxu1  ;;  %v3843_v54 = vpop.f32.mrb[45].mxu0 }
 0x207   : > { %4992 = vst [vmem:[#allocation16_spill] sm:$0xff] %v3841_v56  ;;  %4993 = vst [vmem:[#allocation17_spill] sm:$0xff] %v3843_v54  ;;  %v1181_v11 = vmax.f32 %v3838_v48, %v3841_v56  ;;  %v3847_v10 = vpop.f32.mrb[46].mxu0  ;;  %1179 = vmax.xlane.f32.xlu1 %v1178_v55  ;;  %v3849_v63 = vpop.f32.mrb[46].mxu1 }
 0x208   : > { %4994 = vst [vmem:[#allocation18_spill] sm:$0xff] %v3847_v10  ;;  %4995 = vst [vmem:[#allocation19_spill] sm:$0xff] %v3849_v63  ;;  %v3851_v23 = vpop.f32.mrb[47].mxu1  ;;  %v3853_v26 = vpop.f32.mrb[47].mxu0 }
 0x209   : > { %4996 = vst [vmem:[#allocation20_spill] sm:$0xff] %v3851_v23  ;;  %4997 = vst [vmem:[#allocation21_spill] sm:$0xff] %v3853_v26  ;;  %v1186_v39 = vmax.f32 %v3849_v63, %v3851_v23  ;;  %v1182_v40 = vmax.f32 %v1181_v11, %v3836_v43 }
 0x20b   : > { %v1183_v12 = vmax.f32 %v1182_v40, %v3843_v54  ;;  %v1187_v9 = vmax.f32 %v1186_v39, %v3847_v10 }
 0x20d   : > { %v3860_v59 = vpop.f32.mrb[48].mxu0  ;;  %1184 = vmax.xlane.f32.xlu0 %v1183_v12  ;;  %v3862_v56 = vpop.f32.mrb[48].mxu1  ;;  %v1188_v55 = vmax.f32 %v1187_v9, %v3853_v26 }
 0x20e   : > { %4998 = vst [vmem:[#allocation22_spill] sm:$0xff] %v3860_v59  ;;  %4999 = vst [vmem:[#allocation23_spill] sm:$0xff] %v3862_v56  ;;  %v3865_v48 = vpop.f32.mrb[49].mxu1  ;;  %v3867_v53 = vpop.f32.mrb[49].mxu0 }
 0x20f   : > { %5000 = vst [vmem:[#allocation24_spill] sm:$0xff] %v3865_v48  ;;  %5001 = vst [vmem:[#allocation25_spill] sm:$0xff] %v3867_v53  ;;  %v1191_v23 = vmax.f32 %v3862_v56, %v3865_v48  ;;  %v3871_v63 = vpop.f32.mrb[50].mxu0  ;;  %1189 = vmax.xlane.f32.xlu1 %v1188_v55  ;;  %v3873_v11 = vpop.f32.mrb[50].mxu1 }
 0x210   : > { %5002 = vst [vmem:[#allocation26_spill] sm:$0xff] %v3871_v63  ;;  %5003 = vst [vmem:[#allocation27_spill] sm:$0xff] %v3873_v11  ;;  %v3875_v39 = vpop.f32.mrb[51].mxu1  ;;  %v3877_v40 = vpop.f32.mrb[51].mxu0 }
 0x211   : > { %5004 = vst [vmem:[#allocation28_spill] sm:$0xff] %v3875_v39  ;;  %5005 = vst [vmem:[#allocation29_spill] sm:$0xff] %v3877_v40  ;;  %v1196_v12 = vmax.f32 %v3873_v11, %v3875_v39  ;;  %v1192_v9 = vmax.f32 %v1191_v23, %v3860_v59 }
 0x213   : > { %v1193_v26 = vmax.f32 %v1192_v9, %v3867_v53  ;;  %v1197_v10 = vmax.f32 %v1196_v12, %v3871_v63 }
 0x215   : > { %v3884_v54 = vpop.f32.mrb[52].mxu0  ;;  %1194 = vmax.xlane.f32.xlu0 %v1193_v26  ;;  %v3886_v48 = vpop.f32.mrb[52].mxu1  ;;  %v1198_v55 = vmax.f32 %v1197_v10, %v3877_v40 }
 0x216   : > { %5006 = vst [vmem:[#allocation30_spill] sm:$0xff] %v3884_v54  ;;  %5007 = vst [vmem:[#allocation31_spill] sm:$0xff] %v3886_v48  ;;  %v3889_v56 = vpop.f32.mrb[53].mxu1  ;;  %v3891_v43 = vpop.f32.mrb[53].mxu0 }
 0x217   : > { %5008 = vst [vmem:[#allocation32_spill] sm:$0xff] %v3889_v56  ;;  %5009 = vst [vmem:[#allocation33_spill] sm:$0xff] %v3891_v43  ;;  %v1201_v39 = vmax.f32 %v3886_v48, %v3889_v56  ;;  %v3895_v11 = vpop.f32.mrb[54].mxu0  ;;  %1199 = vmax.xlane.f32.xlu1 %v1198_v55  ;;  %v3897_v23 = vpop.f32.mrb[54].mxu1 }
 0x218   : > { %5010 = vst [vmem:[#allocation34_spill] sm:$0xff] %v3895_v11  ;;  %5011 = vst [vmem:[#allocation35_spill] sm:$0xff] %v3897_v23  ;;  %v3899_v12 = vpop.f32.mrb[55].mxu1  ;;  %v3901_v9 = vpop.f32.mrb[55].mxu0 }
 0x219   : > { %5012 = vst [vmem:[#allocation36_spill] sm:$0xff] %v3899_v12  ;;  %5013 = vst [vmem:[#allocation37_spill] sm:$0xff] %v3901_v9  ;;  %v1206_v26 = vmax.f32 %v3897_v23, %v3899_v12  ;;  %v1202_v10 = vmax.f32 %v1201_v39, %v3884_v54 }
 0x21b   : > { %v1203_v40 = vmax.f32 %v1202_v10, %v3891_v43  ;;  %v1207_v63 = vmax.f32 %v1206_v26, %v3895_v11 }
 0x21d   : > { %v3908_v53 = vpop.f32.mrb[56].mxu0  ;;  %1204 = vmax.xlane.f32.xlu0 %v1203_v40  ;;  %v3910_v56 = vpop.f32.mrb[56].mxu1  ;;  %v1208_v55 = vmax.f32 %v1207_v63, %v3901_v9 }
 0x21e   : > { %5014 = vst [vmem:[#allocation38_spill] sm:$0xff] %v3908_v53  ;;  %5015 = vst [vmem:[#allocation39_spill] sm:$0xff] %v3910_v56  ;;  %v3913_v48 = vpop.f32.mrb[57].mxu1  ;;  %v3915_v59 = vpop.f32.mrb[57].mxu0 }
 0x21f   : > { %5016 = vst [vmem:[#allocation40_spill] sm:$0xff] %v3913_v48  ;;  %5017 = vst [vmem:[#allocation41_spill] sm:$0xff] %v3915_v59  ;;  %v1211_v12 = vmax.f32 %v3910_v56, %v3913_v48  ;;  %v3919_v23 = vpop.f32.mrb[58].mxu0  ;;  %1209 = vmax.xlane.f32.xlu1 %v1208_v55  ;;  %v3921_v39 = vpop.f32.mrb[58].mxu1 }
 0x220   : > { %5018 = vst [vmem:[#allocation42_spill] sm:$0xff] %v3919_v23  ;;  %5019 = vst [vmem:[#allocation43_spill] sm:$0xff] %v3921_v39  ;;  %v3923_v26 = vpop.f32.mrb[59].mxu1  ;;  %v3925_v10 = vpop.f32.mrb[59].mxu0 }
 0x221   : > { %5020 = vst [vmem:[#allocation44_spill] sm:$0xff] %v3923_v26  ;;  %5021 = vst [vmem:[#allocation45_spill] sm:$0xff] %v3925_v10  ;;  %v1216_v40 = vmax.f32 %v3921_v39, %v3923_v26  ;;  %v1212_v63 = vmax.f32 %v1211_v12, %v3908_v53 }
 0x223   : > { %v1213_v9 = vmax.f32 %v1212_v63, %v3915_v59  ;;  %v1217_v11 = vmax.f32 %v1216_v40, %v3919_v23 }
 0x225   : > { %v3932_v43 = vpop.f32.mrb[60].mxu0  ;;  %1214 = vmax.xlane.f32.xlu0 %v1213_v9  ;;  %v3934_v48 = vpop.f32.mrb[60].mxu1  ;;  %v1218_v55 = vmax.f32 %v1217_v11, %v3925_v10 }
 0x226   : > { %5022 = vst [vmem:[#allocation46_spill] sm:$0xff] %v3932_v43  ;;  %5023 = vst [vmem:[#allocation47_spill] sm:$0xff] %v3934_v48  ;;  %v3937_v56 = vpop.f32.mrb[61].mxu1  ;;  %v3939_v54 = vpop.f32.mrb[61].mxu0 }
 0x227   : > { %5024 = vst [vmem:[#allocation48_spill] sm:$0xff] %v3937_v56  ;;  %5025 = vst [vmem:[#allocation49_spill] sm:$0xff] %v3939_v54  ;;  %v1221_v26 = vmax.f32 %v3934_v48, %v3937_v56  ;;  %v3943_v39 = vpop.f32.mrb[62].mxu0  ;;  %1219 = vmax.xlane.f32.xlu1 %v1218_v55  ;;  %v3945_v12 = vpop.f32.mrb[62].mxu1 }
 0x228   : > { %5026 = vst [vmem:[#allocation50_spill] sm:$0xff] %v3943_v39  ;;  %5027 = vst [vmem:[#allocation51_spill] sm:$0xff] %v3945_v12  ;;  %v3947_v40 = vpop.f32.mrb[63].mxu1  ;;  %v3949_v63 = vpop.f32.mrb[63].mxu0 }
 0x229   : > { %5028 = vst [vmem:[#allocation52_spill] sm:$0xff] %v3947_v40  ;;  %5029 = vst [vmem:[#allocation53_spill] sm:$0xff] %v3949_v63  ;;  %v1226_v9 = vmax.f32 %v3945_v12, %v3947_v40  ;;  %v1222_v11 = vmax.f32 %v1221_v26, %v3932_v43 }
 0x22b   : > { %v1223_v10 = vmax.f32 %v1222_v11, %v3939_v54  ;;  %v1227_v23 = vmax.f32 %v1226_v9, %v3943_v39 }
 0x22d   : > { %v3956_v59 = vpop.f32.mrb[64].mxu0  ;;  %1224 = vmax.xlane.f32.xlu0 %v1223_v10  ;;  %v3958_v56 = vpop.f32.mrb[64].mxu1  ;;  %v1228_v55 = vmax.f32 %v1227_v23, %v3949_v63 }
 0x22e   : > { %5030 = vst [vmem:[#allocation54_spill] sm:$0xff] %v3956_v59  ;;  %5031 = vst [vmem:[#allocation55_spill] sm:$0xff] %v3958_v56  ;;  %v3961_v48 = vpop.f32.mrb[65].mxu1  ;;  %v3963_v53 = vpop.f32.mrb[65].mxu0 }
 0x22f   : > { %5032 = vst [vmem:[#allocation56_spill] sm:$0xff] %v3961_v48  ;;  %5033 = vst [vmem:[#allocation57_spill] sm:$0xff] %v3963_v53  ;;  %v1231_v40 = vmax.f32 %v3958_v56, %v3961_v48  ;;  %v3967_v12 = vpop.f32.mrb[66].mxu0  ;;  %1229 = vmax.xlane.f32.xlu1 %v1228_v55  ;;  %v3969_v26 = vpop.f32.mrb[66].mxu1 }
 0x230   : > { %5034 = vst [vmem:[#allocation58_spill] sm:$0xff] %v3967_v12  ;;  %5035 = vst [vmem:[#allocation59_spill] sm:$0xff] %v3969_v26  ;;  %v3971_v9 = vpop.f32.mrb[67].mxu1  ;;  %v3973_v11 = vpop.f32.mrb[67].mxu0 }
 0x231   : > { %5036 = vst [vmem:[#allocation60_spill] sm:$0xff] %v3971_v9  ;;  %5037 = vst [vmem:[#allocation61_spill] sm:$0xff] %v3973_v11  ;;  %v1236_v10 = vmax.f32 %v3969_v26, %v3971_v9  ;;  %v1232_v23 = vmax.f32 %v1231_v40, %v3956_v59 }
 0x233   : > { %v1233_v63 = vmax.f32 %v1232_v23, %v3963_v53  ;;  %v1237_v39 = vmax.f32 %v1236_v10, %v3967_v12 }
 0x235   : > { %v3980_v54 = vpop.f32.mrb[68].mxu0  ;;  %1234 = vmax.xlane.f32.xlu0 %v1233_v63  ;;  %v3982_v48 = vpop.f32.mrb[68].mxu1  ;;  %v1238_v55 = vmax.f32 %v1237_v39, %v3973_v11 }
 0x236   : > { %5038 = vst [vmem:[#allocation62_spill] sm:$0xff] %v3980_v54  ;;  %5039 = vst [vmem:[#allocation63_spill] sm:$0xff] %v3982_v48  ;;  %v3985_v56 = vpop.f32.mrb[69].mxu1  ;;  %v3987_v43 = vpop.f32.mrb[69].mxu0 }
 0x237   : > { %5040 = vst [vmem:[#allocation64_spill] sm:$0xff] %v3985_v56  ;;  %5041 = vst [vmem:[#allocation65_spill] sm:$0xff] %v3987_v43  ;;  %v1241_v9 = vmax.f32 %v3982_v48, %v3985_v56  ;;  %v3991_v26 = vpop.f32.mrb[70].mxu0  ;;  %1239 = vmax.xlane.f32.xlu1 %v1238_v55  ;;  %v3993_v40 = vpop.f32.mrb[70].mxu1 }
 0x238   : > { %5042 = vst [vmem:[#allocation66_spill] sm:$0xff] %v3991_v26  ;;  %5043 = vst [vmem:[#allocation67_spill] sm:$0xff] %v3993_v40  ;;  %v3995_v10 = vpop.f32.mrb[71].mxu1  ;;  %v3997_v23 = vpop.f32.mrb[71].mxu0 }
 0x239   : > { %5044 = vst [vmem:[#allocation68_spill] sm:$0xff] %v3995_v10  ;;  %5045 = vst [vmem:[#allocation69_spill] sm:$0xff] %v3997_v23  ;;  %v1246_v63 = vmax.f32 %v3993_v40, %v3995_v10  ;;  %v1242_v39 = vmax.f32 %v1241_v9, %v3980_v54 }
 0x23b   : > { %v1243_v11 = vmax.f32 %v1242_v39, %v3987_v43  ;;  %v1247_v12 = vmax.f32 %v1246_v63, %v3991_v26 }
 0x23d   : > { %v4004_v53 = vpop.f32.mrb[72].mxu0  ;;  %1244 = vmax.xlane.f32.xlu0 %v1243_v11  ;;  %v4006_v56 = vpop.f32.mrb[72].mxu1  ;;  %v1248_v55 = vmax.f32 %v1247_v12, %v3997_v23 }
 0x23e   : > { %5046 = vst [vmem:[#allocation70_spill] sm:$0xff] %v4004_v53  ;;  %5047 = vst [vmem:[#allocation71_spill] sm:$0xff] %v4006_v56  ;;  %v4009_v48 = vpop.f32.mrb[73].mxu1  ;;  %v4011_v59 = vpop.f32.mrb[73].mxu0 }
 0x23f   : > { %5048 = vst [vmem:[#allocation72_spill] sm:$0xff] %v4009_v48  ;;  %5049 = vst [vmem:[#allocation73_spill] sm:$0xff] %v4011_v59  ;;  %v1251_v10 = vmax.f32 %v4006_v56, %v4009_v48  ;;  %v4015_v40 = vpop.f32.mrb[74].mxu0  ;;  %1249 = vmax.xlane.f32.xlu1 %v1248_v55  ;;  %v4017_v9 = vpop.f32.mrb[74].mxu1 }
 0x240   : > { %5050 = vst [vmem:[#allocation74_spill] sm:$0xff] %v4015_v40  ;;  %5051 = vst [vmem:[#allocation75_spill] sm:$0xff] %v4017_v9  ;;  %v4019_v63 = vpop.f32.mrb[75].mxu1  ;;  %v4021_v39 = vpop.f32.mrb[75].mxu0 }
 0x241   : > { %5052 = vst [vmem:[#allocation76_spill] sm:$0xff] %v4019_v63  ;;  %5053 = vst [vmem:[#allocation77_spill] sm:$0xff] %v4021_v39  ;;  %v1256_v11 = vmax.f32 %v4017_v9, %v4019_v63  ;;  %v1252_v12 = vmax.f32 %v1251_v10, %v4004_v53 }
 0x243   : > { %v1253_v23 = vmax.f32 %v1252_v12, %v4011_v59  ;;  %v1257_v26 = vmax.f32 %v1256_v11, %v4015_v40 }
 0x245   : > { %v4028_v43 = vpop.f32.mrb[76].mxu0  ;;  %1254 = vmax.xlane.f32.xlu0 %v1253_v23  ;;  %v4030_v48 = vpop.f32.mrb[76].mxu1  ;;  %v1258_v55 = vmax.f32 %v1257_v26, %v4021_v39 }
 0x246   : > { %5054 = vst [vmem:[#allocation78_spill] sm:$0xff] %v4028_v43  ;;  %5055 = vst [vmem:[#allocation79_spill] sm:$0xff] %v4030_v48  ;;  %v4033_v56 = vpop.f32.mrb[77].mxu1  ;;  %v4035_v54 = vpop.f32.mrb[77].mxu0 }
 0x247   : > { %5056 = vst [vmem:[#allocation80_spill] sm:$0xff] %v4033_v56  ;;  %v1261_v63 = vmax.f32 %v4030_v48, %v4033_v56  ;;  %v4039_v9 = vpop.f32.mrb[78].mxu0  ;;  %1259 = vmax.xlane.f32.xlu1 %v1258_v55  ;;  %v4041_v10 = vpop.f32.mrb[78].mxu1 }
 0x248   : > { %5057 = vst [vmem:[#allocation81_spill] sm:$0xff] %v4041_v10  ;;  %v4043_v11 = vpop.f32.mrb[79].mxu1  ;;  %v4045_v12 = vpop.f32.mrb[79].mxu0 }
 0x249   : > { %5058 = vst [vmem:[#allocation82_spill] sm:$0xff] %v4043_v11  ;;  %v1266_v23 = vmax.f32 %v4041_v10, %v4043_v11  ;;  %v1262_v26 = vmax.f32 %v1261_v63, %v4028_v43 }
 0x24b   : > { %v1267_v39 = vmax.f32 %v1266_v23, %v4039_v9  ;;  %v1263_v40 = vmax.f32 %v1262_v26, %v4035_v54 }
 0x24d   : > { %v1268_v56 = vmax.f32 %v1267_v39, %v4045_v12  ;;  %1264 = vmax.xlane.f32.xlu0 %v1263_v40 }
 0x24f   : > { %1269 = vmax.xlane.f32.xlu1 %v1268_v56 }
 0x262   : > { %v1115_v55 = vpop.xlane.xlu0 %1114 }
 0x263   : > { %v1271_v48 = vsub.f32 %v3669_v47, %v1115_v55  ;;  %v1272_v59 = vsub.f32 %v3673_v3, %v1115_v55  ;;  %v1273_v53 = vsub.f32 %v3671_v61, %v1115_v55  ;;  %v1274_v38 = vsub.f32 %v3675_v4, %v1115_v55 }
 0x265   : > { %v1399_v11 = vmul.f32 1.442695, %v1271_v48  ;;  %v1401_v10 = vmul.f32 1.442695, %v1272_v59  ;;  %v1403_v63 = vmul.f32 1.442695, %v1273_v53 }
 0x266   : > { %v1405_v43 = vmul.f32 1.442695, %v1274_v38  ;;  %v1120_v23 = vpop.xlane.xlu0 %1119 }
 0x267   : > { %2958 = vpow2.f32 %v1399_v11  ;;  %v1275_v26 = vsub.f32 %v3679_v6, %v1120_v23  ;;  %v1276_v40 = vsub.f32 %v3683_v46, %v1120_v23  ;;  %v1277_v56 = vsub.f32 %v3681_v7, %v1120_v23 }
 0x268   : > { %2960 = vpow2.f32 %v1401_v10  ;;  %v1278_v47 = vsub.f32 %v3685_v8, %v1120_v23 }
 0x269   : > { %2962 = vpow2.f32 %v1403_v63  ;;  %v1407_v3 = vmul.f32 1.442695, %v1275_v26  ;;  %v1409_v61 = vmul.f32 1.442695, %v1276_v40  ;;  %v1411_v39 = vmul.f32 1.442695, %v1277_v56 }
 0x26a   : > { %2964 = vpow2.f32 %v1405_v43  ;;  %v1413_v4 = vmul.f32 1.442695, %v1278_v47  ;;  %v1125_v59 = vpop.xlane.xlu1 %1124 }
 0x26b   : > { %2966 = vpow2.f32 %v1407_v3  ;;  %v1279_v38 = vsub.f32 %v3694_v14, %v1125_v59  ;;  %v1280_v53 = vsub.f32 %v3697_v16, %v1125_v59  ;;  %v1281_v6 = vsub.f32 %v3692_v13, %v1125_v59 }
 0x26c   : > { %2968 = vpow2.f32 %v1409_v61  ;;  %v1282_v7 = vsub.f32 %v3699_v17, %v1125_v59 }
 0x26d   : > { %2970 = vpow2.f32 %v1411_v39  ;;  %v1415_v46 = vmul.f32 1.442695, %v1279_v38  ;;  %v1417_v8 = vmul.f32 1.442695, %v1280_v53  ;;  %v1419_v48 = vmul.f32 1.442695, %v1281_v6 }
 0x26e   : > { %2972 = vpow2.f32 %v1413_v4  ;;  %v1421_v10 = vmul.f32 1.442695, %v1282_v7  ;;  %v1130_v11 = vpop.xlane.xlu1 %1129 }
 0x26f   : > { %2974 = vpow2.f32 %v1415_v46  ;;  %v1283_v43 = vsub.f32 %v3703_v19, %v1130_v11  ;;  %v1284_v55 = vsub.f32 %v3707_v21, %v1130_v11  ;;  %v1285_v14 = vsub.f32 %v3705_v20, %v1130_v11 }
 0x270   : > { %2976 = vpow2.f32 %v1417_v8  ;;  %v1286_v13 = vsub.f32 %v3709_v22, %v1130_v11 }
 0x271   : > { %v4069_v16 = vpop.eup %2958  ;;  %2978 = vpow2.f32 %v1419_v48  ;;  %v1423_v17 = vmul.f32 1.442695, %v1283_v43  ;;  %v1425_v63 = vmul.f32 1.442695, %v1284_v55  ;;  %v1427_v23 = vmul.f32 1.442695, %v1285_v14 }
 0x272   : > { %v4071_v26 = vpop.eup %2960  ;;  %2980 = vpow2.f32 %v1421_v10  ;;  %v1429_v40 = vmul.f32 1.442695, %v1286_v13  ;;  %v1135_v56 = vpop.xlane.xlu0 %1134 }
 0x273   : > { %v4073_v47 = vpop.eup %2962  ;;  %2982 = vpow2.f32 %v1423_v17  ;;  %v1287_v19 = vsub.f32 %v3718_v28, %v1135_v56  ;;  %v1288_v20 = vsub.f32 %v3721_v30, %v1135_v56  ;;  %v1289_v21 = vsub.f32 %v3716_v27, %v1135_v56 }
 0x274   : > { %v4078_v22 = vpop.eup %2964  ;;  %2984 = vpow2.f32 %v1425_v63  ;;  %v1290_v3 = vsub.f32 %v3723_v31, %v1135_v56  ;;  %v1140_v61 = vpop.xlane.xlu1 %1139  ;;  %v1655_v39 = vadd.f32 %v4071_v26, %v4069_v16 }
 0x275   : > { %v4083_v4 = vpop.eup %2966  ;;  %2986 = vpow2.f32 %v1427_v23  ;;  %v1431_v59 = vmul.f32 1.442695, %v1287_v19  ;;  %v1433_v38 = vmul.f32 1.442695, %v1288_v20  ;;  %v1435_v53 = vmul.f32 1.442695, %v1289_v21 }
 0x276   : > { %v4085_v28 = vpop.eup %2968  ;;  %2988 = vpow2.f32 %v1429_v40  ;;  %v1437_v30 = vmul.f32 1.442695, %v1290_v3  ;;  %v1291_v27 = vsub.f32 %v3727_v33, %v1140_v61  ;;  %v1292_v6 = vsub.f32 %v3731_v35, %v1140_v61 }
 0x277   : > { %v4089_v7 = vpop.eup %2970  ;;  %2990 = vpow2.f32 %v1431_v59  ;;  %v1293_v31 = vsub.f32 %v3729_v34, %v1140_v61  ;;  %v1294_v46 = vsub.f32 %v3733_v36, %v1140_v61  ;;  %v1656_v8 = vadd.f32 %v4073_v47, %v1655_v39 }
 0x278   : > { %v4094_v48 = vpop.eup %2972  ;;  %2992 = vpow2.f32 %v1433_v38  ;;  %v1439_v10 = vmul.f32 1.442695, %v1291_v27  ;;  %v1441_v11 = vmul.f32 1.442695, %v1292_v6  ;;  %v1660_v43 = vadd.f32 %v4085_v28, %v4083_v4 }
 0x279   : > { %v4098_v33 = vpop.eup %2974  ;;  %2994 = vpow2.f32 %v1435_v53  ;;  %v1443_v35 = vmul.f32 1.442695, %v1293_v31  ;;  %v1657_v55 = vadd.f32 %v4078_v22, %v1656_v8  ;;  %v1445_v34 = vmul.f32 1.442695, %v1294_v46 }
 0x27a   : > { %v4101_v14 = vpop.eup %2976  ;;  %2996 = vpow2.f32 %v1437_v30  ;;  %v1145_v36 = vpop.xlane.xlu0 %1144  ;;  %v1661_v13 = vadd.f32 %v4089_v7, %v1660_v43 }
 0x27b   : > { %v4104_v17 = vpop.eup %2978  ;;  %2998 = vpow2.f32 %v1439_v10  ;;  %1658 = vadd.xlane.f32.xlu0 %v1657_v55  ;;  %v1295_v63 = vsub.f32 %v3742_v42, %v1145_v36  ;;  %v1296_v23 = vsub.f32 %v3745_v44, %v1145_v36  ;;  %v1297_v40 = vsub.f32 %v3740_v41, %v1145_v36 }
 0x27c   : > { %v4109_v56 = vpop.eup %2980  ;;  %3000 = vpow2.f32 %v1441_v11  ;;  %v1298_v19 = vsub.f32 %v3747_v45, %v1145_v36  ;;  %v1150_v20 = vpop.xlane.xlu1 %1149  ;;  %v1662_v21 = vadd.f32 %v4094_v48, %v1661_v13  ;;  %v1665_v3 = vadd.f32 %v4101_v14, %v4098_v33 }
 0x27d   : > { %v4115_v61 = vpop.eup %2982  ;;  %3002 = vpow2.f32 %v1443_v35  ;;  %v1447_v39 = vmul.f32 1.442695, %v1295_v63  ;;  %v1449_v42 = vmul.f32 1.442695, %v1296_v23  ;;  %v1451_v59 = vmul.f32 1.442695, %v1297_v40 }
 0x27e   : > { %v4117_v44 = vpop.eup %2984  ;;  %3004 = vpow2.f32 %v1445_v34  ;;  %v1453_v41 = vmul.f32 1.442695, %v1298_v19  ;;  %v1299_v38 = vsub.f32 %v3753_v50, %v1150_v20  ;;  %v1300_v45 = vsub.f32 %v3755_v51, %v1150_v20  ;;  %1663 = vadd.xlane.f32.xlu1 %v1662_v21 }
 0x27f   : > { %v4121_v53 = vpop.eup %2986  ;;  %3006 = vpow2.f32 %v1447_v39  ;;  %v1301_v30 = vsub.f32 %v3751_v49, %v1150_v20  ;;  %v1302_v27 = vsub.f32 %v3757_v52, %v1150_v20  ;;  %v1666_v6 = vadd.f32 %v4104_v17, %v1665_v3 }
 0x280   : > { %v4126_v31 = vpop.eup %2988  ;;  %3008 = vpow2.f32 %v1449_v42  ;;  %v1455_v46 = vmul.f32 1.442695, %v1299_v38  ;;  %v1457_v8 = vmul.f32 1.442695, %v1300_v45  ;;  %v1670_v50 = vadd.f32 %v4117_v44, %v4115_v61 }
 0x281   : > { %v4130_v10 = vpop.eup %2990  ;;  %3010 = vpow2.f32 %v1451_v59  ;;  %v1459_v51 = vmul.f32 1.442695, %v1301_v30  ;;  %v1667_v11 = vadd.f32 %v4109_v56, %v1666_v6  ;;  %v1461_v49 = vmul.f32 1.442695, %v1302_v27 }
 0x282   : > { %v4133_v43 = vpop.eup %2992  ;;  %3012 = vpow2.f32 %v1453_v41  ;;  %v1155_v52 = vpop.xlane.xlu0 %1154  ;;  %v1671_v35 = vadd.f32 %v4121_v53, %v1670_v50 }
 0x283   : > { %v4136_v55 = vpop.eup %2994  ;;  %3014 = vpow2.f32 %v1455_v46  ;;  %1668 = vadd.xlane.f32.xlu0 %v1667_v11  ;;  %v1303_v34 = vsub.f32 %v3766_v58, %v1155_v52  ;;  %v1304_v36 = vsub.f32 %v3769_v60, %v1155_v52  ;;  %v1305_v13 = vsub.f32 %v3764_v57, %v1155_v52 }
 0x284   : > { %v4141_v63 = vpop.eup %2996  ;;  %3016 = vpow2.f32 %v1457_v8  ;;  %v1306_v23 = vsub.f32 %v3771_v62, %v1155_v52  ;;  %v1160_v40 = vpop.xlane.xlu1 %1159  ;;  %v1672_v19 = vadd.f32 %v4126_v31, %v1671_v35  ;;  %v1675_v20 = vadd.f32 %v4133_v43, %v4130_v10 }
 0x285   : > { %v4147_v21 = vpop.eup %2998  ;;  %3018 = vpow2.f32 %v1459_v51  ;;  %v1463_v3 = vmul.f32 1.442695, %v1303_v34  ;;  %v1465_v58 = vmul.f32 1.442695, %v1304_v36  ;;  %v1467_v39 = vmul.f32 1.442695, %v1305_v13 }
 0x286   : > { %v4149_v60 = vpop.eup %3000  ;;  %3020 = vpow2.f32 %v1461_v49  ;;  %v1469_v57 = vmul.f32 1.442695, %v1306_v23  ;;  %v1307_v42 = vsub.f32 %v3777_v1, %v1160_v40  ;;  %v1308_v62 = vsub.f32 %v3779_v2, %v1160_v40  ;;  %1673 = vadd.xlane.f32.xlu1 %v1672_v19 }
 0x287   : > { %v4153_v59 = vpop.eup %3002  ;;  %3022 = vpow2.f32 %v1463_v3  ;;  %v1309_v41 = vsub.f32 %v3775_v0, %v1160_v40  ;;  %v1310_v38 = vsub.f32 %v3781_v5, %v1160_v40  ;;  %v1676_v45 = vadd.f32 %v4136_v55, %v1675_v20 }
 0x288   : > { %v4158_v30 = vpop.eup %3004  ;;  %3024 = vpow2.f32 %v1465_v58  ;;  %v1471_v27 = vmul.f32 1.442695, %v1307_v42  ;;  %v1473_v6 = vmul.f32 1.442695, %v1308_v62  ;;  %v1680_v1 = vadd.f32 %v4149_v60, %v4147_v21  ;;  %v5059_v42 = vld [vmem:[#allocation5_spill] sm:$0xff] }
 0x289   : > { %v4162_v46 = vpop.eup %3006  ;;  %3026 = vpow2.f32 %v1467_v39  ;;  %v1475_v2 = vmul.f32 1.442695, %v1309_v41  ;;  %v1677_v8 = vadd.f32 %v4141_v63, %v1676_v45  ;;  %v1477_v0 = vmul.f32 1.442695, %v1310_v38 }
 0x28a   : > { %v4165_v50 = vpop.eup %3008  ;;  %3028 = vpow2.f32 %v1469_v57  ;;  %v1165_v5 = vpop.xlane.xlu0 %1164  ;;  %v1681_v51 = vadd.f32 %v4153_v59, %v1680_v1 }
 0x28b   : > { %v4168_v11 = vpop.eup %3010  ;;  %3030 = vpow2.f32 %v1471_v27  ;;  %1678 = vadd.xlane.f32.xlu0 %v1677_v8  ;;  %v1311_v49 = vsub.f32 %v3790_v18, %v1165_v5  ;;  %v1312_v52 = vsub.f32 %v3793_v24, %v1165_v5  ;;  %v1313_v35 = vsub.f32 %v3788_v15, %v1165_v5 }
 0x28c   : > { %v4173_v34 = vpop.eup %3012  ;;  %3032 = vpow2.f32 %v1473_v6  ;;  %v1314_v36 = vsub.f32 %v3795_v25, %v1165_v5  ;;  %v1682_v13 = vadd.f32 %v4158_v30, %v1681_v51  ;;  %v1170_v23 = vpop.xlane.xlu1 %1169  ;;  %v1685_v40 = vadd.f32 %v4165_v50, %v4162_v46  ;;  %v5060_v51 = vld [vmem:[#allocation7_spill] sm:$0xff] }
 0x28d   : > { %v4179_v19 = vpop.eup %3014  ;;  %3034 = vpow2.f32 %v1475_v2  ;;  %v1479_v20 = vmul.f32 1.442695, %v1311_v49  ;;  %v1481_v18 = vmul.f32 1.442695, %v1312_v52  ;;  %v1483_v3 = vmul.f32 1.442695, %v1313_v35 }
 0x28e   : > { %v4181_v24 = vpop.eup %3016  ;;  %3036 = vpow2.f32 %v1477_v0  ;;  %v1485_v15 = vmul.f32 1.442695, %v1314_v36  ;;  %1683 = vadd.xlane.f32.xlu1 %v1682_v13  ;;  %v1315_v58 = vsub.f32 %v3801_v32, %v1170_v23  ;;  %v1316_v25 = vsub.f32 %v3803_v37, %v1170_v23  ;;  %v5061_v52 = vld [vmem:[#allocation8_spill] sm:$0xff]  ;;  %v5062_v36 = vld [vmem:[#allocation6_spill] sm:$0xff] }
 0x28f   : > { %v4185_v39 = vpop.eup %3018  ;;  %3038 = vpow2.f32 %v1479_v20  ;;  %v1317_v57 = vsub.f32 %v3799_v29, %v1170_v23  ;;  %v1318_v62 = vsub.f32 %v5059_v42, %v1170_v23  ;;  %v1686_v41 = vadd.f32 %v4168_v11, %v1685_v40  ;;  %v5064_v40 = vld [vmem:[#allocation9_spill] sm:$0xff] }
 0x290   : > { %v4190_v38 = vpop.eup %3020  ;;  %3040 = vpow2.f32 %v1481_v18  ;;  %v1487_v45 = vmul.f32 1.442695, %v1315_v58  ;;  %v1489_v27 = vmul.f32 1.442695, %v1316_v25  ;;  %v1690_v6 = vadd.f32 %v4181_v24, %v4179_v19 }
 0x291   : > { %v4194_v32 = vpop.eup %3022  ;;  %3042 = vpow2.f32 %v1483_v3  ;;  %v1491_v37 = vmul.f32 1.442695, %v1317_v57  ;;  %v1687_v1 = vadd.f32 %v4173_v34, %v1686_v41  ;;  %v1493_v29 = vmul.f32 1.442695, %v1318_v62 }
 0x292   : > { %v4197_v2 = vpop.eup %3024  ;;  %3044 = vpow2.f32 %v1485_v15  ;;  %v1175_v8 = vpop.xlane.xlu0 %1174  ;;  %v1691_v0 = vadd.f32 %v4185_v39, %v1690_v6  ;;  %v5068_v6 = vld [vmem:[#allocation12_spill] sm:$0xff] }
 0x293   : > { %v4200_v5 = vpop.eup %3026  ;;  %3046 = vpow2.f32 %v1487_v45  ;;  %1688 = vadd.xlane.f32.xlu0 %v1687_v1  ;;  %v1319_v49 = vsub.f32 %v5060_v51, %v1175_v8  ;;  %v1320_v35 = vsub.f32 %v5061_v52, %v1175_v8  ;;  %v1321_v13 = vsub.f32 %v5062_v36, %v1175_v8  ;;  %v5067_v45 = vld [vmem:[#allocation11_spill] sm:$0xff]  ;;  %v5071_v52 = vld [vmem:[#allocation13_spill] sm:$0xff] }
 0x294   : > { %v4205_v23 = vpop.eup %3028  ;;  %3048 = vpow2.f32 %v1489_v27  ;;  %v1322_v20 = vsub.f32 %v5064_v40, %v1175_v8  ;;  %v1692_v18 = vadd.f32 %v4190_v38, %v1691_v0  ;;  %v1180_v3 = vpop.xlane.xlu1 %1179  ;;  %v1695_v15 = vadd.f32 %v4197_v2, %v4194_v32  ;;  %v5070_v0 = vld [vmem:[#allocation10_spill] sm:$0xff] }
 0x295   : > { %5063 = vst [vmem:[#allocation5_spill] sm:$0xff] %v4205_v23  ;;  %v4211_v58 = vpop.eup %3030  ;;  %3050 = vpow2.f32 %v1491_v37  ;;  %v1495_v25 = vmul.f32 1.442695, %v1319_v49  ;;  %v1497_v57 = vmul.f32 1.442695, %v1320_v35  ;;  %v1323_v27 = vsub.f32 %v5067_v45, %v1180_v3 }
 0x296   : > { %5065 = vst [vmem:[#allocation7_spill] sm:$0xff] %v4211_v58  ;;  %v1499_v42 = vmul.f32 1.442695, %v1321_v13  ;;  %v4213_v62 = vpop.eup %3032  ;;  %3052 = vpow2.f32 %v1493_v29  ;;  %v1501_v41 = vmul.f32 1.442695, %v1322_v20  ;;  %1693 = vadd.xlane.f32.xlu1 %v1692_v18  ;;  %v1324_v1 = vsub.f32 %v5068_v6, %v1180_v3 }
 0x297   : > { %5066 = vst [vmem:[#allocation8_spill] sm:$0xff] %v4213_v62  ;;  %v4217_v8 = vpop.eup %3034  ;;  %3054 = vpow2.f32 %v1495_v25  ;;  %v1325_v51 = vsub.f32 %v5070_v0, %v1180_v3  ;;  %v1326_v36 = vsub.f32 %v5071_v52, %v1180_v3  ;;  %v1696_v37 = vadd.f32 %v4200_v5, %v1695_v15  ;;  %v5078_v52 = vld [vmem:[#allocation14_spill] sm:$0xff] }
 0x298   : > { %5069 = vst [vmem:[#allocation6_spill] sm:$0xff] %v4217_v8  ;;  %v4222_v49 = vpop.eup %3036  ;;  %3056 = vpow2.f32 %v1497_v57  ;;  %v1503_v35 = vmul.f32 1.442695, %v1323_v27  ;;  %v1505_v29 = vmul.f32 1.442695, %v1324_v1  ;;  %v1700_v13 = vadd.f32 %v4213_v62, %v4211_v58  ;;  %v5076_v57 = vld [vmem:[#allocation15_spill] sm:$0xff] }
 0x299   : > { %5072 = vst [vmem:[#allocation9_spill] sm:$0xff] %v4222_v49  ;;  %v4226_v40 = vpop.eup %3038  ;;  %3058 = vpow2.f32 %v1499_v42  ;;  %v1507_v20 = vmul.f32 1.442695, %v1325_v51  ;;  %v1697_v18 = vadd.f32 %v4205_v23, %v1696_v37  ;;  %v1509_v3 = vmul.f32 1.442695, %v1326_v36  ;;  %v5077_v1 = vld [vmem:[#allocation16_spill] sm:$0xff] }
 0x29a   : > { %5073 = vst [vmem:[#allocation11_spill] sm:$0xff] %v4226_v40  ;;  %v4229_v25 = vpop.eup %3040  ;;  %3060 = vpow2.f32 %v1501_v41  ;;  %v1185_v45 = vpop.xlane.xlu0 %1184  ;;  %v1701_v15 = vadd.f32 %v4217_v8, %v1700_v13  ;;  %v5080_v37 = vld [vmem:[#allocation17_spill] sm:$0xff] }
 0x29b   : > { %5074 = vst [vmem:[#allocation12_spill] sm:$0xff] %v4229_v25  ;;  %v4232_v6 = vpop.eup %3042  ;;  %3062 = vpow2.f32 %v1503_v35  ;;  %1698 = vadd.xlane.f32.xlu0 %v1697_v18  ;;  %v1327_v27 = vsub.f32 %v5076_v57, %v1185_v45  ;;  %v1328_v0 = vsub.f32 %v5077_v1, %v1185_v45  ;;  %v1329_v42 = vsub.f32 %v5078_v52, %v1185_v45 }
 0x29c   : > { %5075 = vst [vmem:[#allocation10_spill] sm:$0xff] %v4232_v6  ;;  %v4237_v51 = vpop.eup %3044  ;;  %3064 = vpow2.f32 %v1505_v29  ;;  %v1330_v62 = vsub.f32 %v5080_v37, %v1185_v45  ;;  %v1702_v41 = vadd.f32 %v4222_v49, %v1701_v15  ;;  %v1190_v36 = vpop.xlane.xlu1 %1189  ;;  %v1705_v13 = vadd.f32 %v4229_v25, %v4226_v40  ;;  %v5083_v29 = vld [vmem:[#allocation19_spill] sm:$0xff]  ;;  %v5084_v45 = vld [vmem:[#allocation20_spill] sm:$0xff]  ;;  %v5086_v49 = vld [vmem:[#allocation18_spill] sm:$0xff] }
 0x29d   : > { %5079 = vst [vmem:[#allocation13_spill] sm:$0xff] %v4237_v51  ;;  %v4243_v8 = vpop.eup %3046  ;;  %3066 = vpow2.f32 %v1507_v20  ;;  %v1511_v35 = vmul.f32 1.442695, %v1327_v27  ;;  %v1513_v18 = vmul.f32 1.442695, %v1328_v0  ;;  %v1331_v58 = vsub.f32 %v5083_v29, %v1190_v36  ;;  %v5087_v40 = vld [vmem:[#allocation21_spill] sm:$0xff] }
 0x29e   : > { %5081 = vst [vmem:[#allocation15_spill] sm:$0xff] %v4243_v8  ;;  %v1515_v57 = vmul.f32 1.442695, %v1329_v42  ;;  %v4245_v1 = vpop.eup %3048  ;;  %3068 = vpow2.f32 %v1509_v3  ;;  %v1517_v52 = vmul.f32 1.442695, %v1330_v62  ;;  %1703 = vadd.xlane.f32.xlu1 %v1702_v41  ;;  %v1332_v37 = vsub.f32 %v5084_v45, %v1190_v36  ;;  %v5093_v45 = vld [vmem:[#allocation24_spill] sm:$0xff] }
 0x29f   : > { %5082 = vst [vmem:[#allocation16_spill] sm:$0xff] %v4245_v1  ;;  %v4249_v15 = vpop.eup %3050  ;;  %3070 = vpow2.f32 %v1511_v35  ;;  %v1333_v25 = vsub.f32 %v5086_v49, %v1190_v36  ;;  %v1334_v23 = vsub.f32 %v5087_v40, %v1190_v36  ;;  %v1706_v20 = vadd.f32 %v4232_v6, %v1705_v13 }
 0x2a0   : > { %5085 = vst [vmem:[#allocation14_spill] sm:$0xff] %v4249_v15  ;;  %v4254_v27 = vpop.eup %3052  ;;  %3072 = vpow2.f32 %v1513_v18  ;;  %v1519_v0 = vmul.f32 1.442695, %v1331_v58  ;;  %v1521_v3 = vmul.f32 1.442695, %v1332_v37  ;;  %v1710_v62 = vadd.f32 %v4245_v1, %v4243_v8  ;;  %v5092_v58 = vld [vmem:[#allocation23_spill] sm:$0xff] }
 0x2a1   : > { %5088 = vst [vmem:[#allocation17_spill] sm:$0xff] %v4254_v27  ;;  %v4258_v42 = vpop.eup %3054  ;;  %3074 = vpow2.f32 %v1515_v57  ;;  %v1523_v41 = vmul.f32 1.442695, %v1333_v25  ;;  %v1707_v35 = vadd.f32 %v4237_v51, %v1706_v20  ;;  %v1525_v49 = vmul.f32 1.442695, %v1334_v23  ;;  %v5094_v1 = vld [vmem:[#allocation22_spill] sm:$0xff] }
 0x2a2   : > { %5089 = vst [vmem:[#allocation19_spill] sm:$0xff] %v4258_v42  ;;  %v4261_v29 = vpop.eup %3056  ;;  %3076 = vpow2.f32 %v1517_v52  ;;  %v1195_v40 = vpop.xlane.xlu0 %1194  ;;  %v1711_v36 = vadd.f32 %v4249_v15, %v1710_v62  ;;  %v5096_v20 = vld [vmem:[#allocation25_spill] sm:$0xff] }
 0x2a3   : > { %5090 = vst [vmem:[#allocation20_spill] sm:$0xff] %v4261_v29  ;;  %v4264_v13 = vpop.eup %3058  ;;  %3078 = vpow2.f32 %v1519_v0  ;;  %1708 = vadd.xlane.f32.xlu0 %v1707_v35  ;;  %v1335_v18 = vsub.f32 %v5092_v58, %v1195_v40  ;;  %v1336_v37 = vsub.f32 %v5093_v45, %v1195_v40  ;;  %v1337_v57 = vsub.f32 %v5094_v1, %v1195_v40 }
 0x2a4   : > { %5091 = vst [vmem:[#allocation18_spill] sm:$0xff] %v4264_v13  ;;  %v4269_v25 = vpop.eup %3060  ;;  %3080 = vpow2.f32 %v1521_v3  ;;  %v1338_v8 = vsub.f32 %v5096_v20, %v1195_v40  ;;  %v1712_v23 = vadd.f32 %v4254_v27, %v1711_v36  ;;  %v1200_v52 = vpop.xlane.xlu1 %1199  ;;  %v1715_v62 = vadd.f32 %v4261_v29, %v4258_v42  ;;  %v5099_v3 = vld [vmem:[#allocation27_spill] sm:$0xff]  ;;  %v5100_v40 = vld [vmem:[#allocation28_spill] sm:$0xff]  ;;  %v5102_v27 = vld [vmem:[#allocation26_spill] sm:$0xff] }
 0x2a5   : > { %5095 = vst [vmem:[#allocation21_spill] sm:$0xff] %v4269_v25  ;;  %v4275_v15 = vpop.eup %3062  ;;  %3082 = vpow2.f32 %v1523_v41  ;;  %v1527_v0 = vmul.f32 1.442695, %v1335_v18  ;;  %v1529_v35 = vmul.f32 1.442695, %v1336_v37  ;;  %v1339_v51 = vsub.f32 %v5099_v3, %v1200_v52  ;;  %v5103_v42 = vld [vmem:[#allocation29_spill] sm:$0xff] }
 0x2a6   : > { %5097 = vst [vmem:[#allocation23_spill] sm:$0xff] %v4275_v15  ;;  %v1531_v58 = vmul.f32 1.442695, %v1337_v57  ;;  %v4277_v45 = vpop.eup %3064  ;;  %3084 = vpow2.f32 %v1525_v49  ;;  %v1533_v1 = vmul.f32 1.442695, %v1338_v8  ;;  %1713 = vadd.xlane.f32.xlu1 %v1712_v23  ;;  %v1340_v20 = vsub.f32 %v5100_v40, %v1200_v52  ;;  %v5109_v40 = vld [vmem:[#allocation32_spill] sm:$0xff] }
 0x2a7   : > { %5098 = vst [vmem:[#allocation24_spill] sm:$0xff] %v4277_v45  ;;  %v4281_v36 = vpop.eup %3066  ;;  %3086 = vpow2.f32 %v1527_v0  ;;  %v1341_v29 = vsub.f32 %v5102_v27, %v1200_v52  ;;  %v1342_v6 = vsub.f32 %v5103_v42, %v1200_v52  ;;  %v1716_v41 = vadd.f32 %v4264_v13, %v1715_v62 }
 0x2a8   : > { %5101 = vst [vmem:[#allocation22_spill] sm:$0xff] %v4281_v36  ;;  %v4286_v18 = vpop.eup %3068  ;;  %3088 = vpow2.f32 %v1529_v35  ;;  %v1535_v37 = vmul.f32 1.442695, %v1339_v51  ;;  %v1537_v49 = vmul.f32 1.442695, %v1340_v20  ;;  %v1720_v8 = vadd.f32 %v4277_v45, %v4275_v15  ;;  %v5108_v51 = vld [vmem:[#allocation31_spill] sm:$0xff] }
 0x2a9   : > { %5104 = vst [vmem:[#allocation25_spill] sm:$0xff] %v4286_v18  ;;  %v4290_v57 = vpop.eup %3070  ;;  %3090 = vpow2.f32 %v1531_v58  ;;  %v1539_v23 = vmul.f32 1.442695, %v1341_v29  ;;  %v1717_v0 = vadd.f32 %v4269_v25, %v1716_v41  ;;  %v1541_v27 = vmul.f32 1.442695, %v1342_v6  ;;  %v5110_v45 = vld [vmem:[#allocation30_spill] sm:$0xff] }
 0x2aa   : > { %5105 = vst [vmem:[#allocation27_spill] sm:$0xff] %v4290_v57  ;;  %v4293_v3 = vpop.eup %3072  ;;  %3092 = vpow2.f32 %v1533_v1  ;;  %v1205_v42 = vpop.xlane.xlu0 %1204  ;;  %v1721_v52 = vadd.f32 %v4281_v36, %v1720_v8  ;;  %v5112_v41 = vld [vmem:[#allocation33_spill] sm:$0xff] }
 0x2ab   : > { %5106 = vst [vmem:[#allocation28_spill] sm:$0xff] %v4293_v3  ;;  %v4296_v62 = vpop.eup %3074  ;;  %3094 = vpow2.f32 %v1535_v37  ;;  %1718 = vadd.xlane.f32.xlu0 %v1717_v0  ;;  %v1343_v35 = vsub.f32 %v5108_v51, %v1205_v42  ;;  %v1344_v20 = vsub.f32 %v5109_v40, %v1205_v42  ;;  %v1345_v58 = vsub.f32 %v5110_v45, %v1205_v42 }
 0x2ac   : > { %5107 = vst [vmem:[#allocation26_spill] sm:$0xff] %v4296_v62  ;;  %v4301_v29 = vpop.eup %3076  ;;  %3096 = vpow2.f32 %v1537_v49  ;;  %v1346_v15 = vsub.f32 %v5112_v41, %v1205_v42  ;;  %v1722_v6 = vadd.f32 %v4286_v18, %v1721_v52  ;;  %v1210_v1 = vpop.xlane.xlu1 %1209  ;;  %v1725_v8 = vadd.f32 %v4293_v3, %v4290_v57  ;;  %v5115_v49 = vld [vmem:[#allocation35_spill] sm:$0xff]  ;;  %v5116_v42 = vld [vmem:[#allocation36_spill] sm:$0xff]  ;;  %v5118_v18 = vld [vmem:[#allocation34_spill] sm:$0xff] }
 0x2ad   : > { %5111 = vst [vmem:[#allocation29_spill] sm:$0xff] %v4301_v29  ;;  %v4307_v36 = vpop.eup %3078  ;;  %3098 = vpow2.f32 %v1539_v23  ;;  %v1543_v37 = vmul.f32 1.442695, %v1343_v35  ;;  %v1545_v0 = vmul.f32 1.442695, %v1344_v20  ;;  %v1347_v25 = vsub.f32 %v5115_v49, %v1210_v1  ;;  %v5119_v57 = vld [vmem:[#allocation37_spill] sm:$0xff] }
 0x2ae   : > { %5113 = vst [vmem:[#allocation31_spill] sm:$0xff] %v4307_v36  ;;  %v1547_v51 = vmul.f32 1.442695, %v1345_v58  ;;  %v4309_v40 = vpop.eup %3080  ;;  %3100 = vpow2.f32 %v1541_v27  ;;  %v1549_v45 = vmul.f32 1.442695, %v1346_v15  ;;  %1723 = vadd.xlane.f32.xlu1 %v1722_v6  ;;  %v1348_v41 = vsub.f32 %v5116_v42, %v1210_v1  ;;  %v5125_v42 = vld [vmem:[#allocation40_spill] sm:$0xff] }
 0x2af   : > { %5114 = vst [vmem:[#allocation32_spill] sm:$0xff] %v4309_v40  ;;  %v4313_v52 = vpop.eup %3082  ;;  %3102 = vpow2.f32 %v1543_v37  ;;  %v1349_v3 = vsub.f32 %v5118_v18, %v1210_v1  ;;  %v1350_v13 = vsub.f32 %v5119_v57, %v1210_v1  ;;  %v1726_v23 = vadd.f32 %v4296_v62, %v1725_v8 }
 0x2b0   : > { %5117 = vst [vmem:[#allocation30_spill] sm:$0xff] %v4313_v52  ;;  %v4318_v35 = vpop.eup %3084  ;;  %3104 = vpow2.f32 %v1545_v0  ;;  %v1551_v20 = vmul.f32 1.442695, %v1347_v25  ;;  %v1553_v27 = vmul.f32 1.442695, %v1348_v41  ;;  %v1730_v15 = vadd.f32 %v4309_v40, %v4307_v36  ;;  %v5124_v25 = vld [vmem:[#allocation39_spill] sm:$0xff] }
 0x2b1   : > { %5120 = vst [vmem:[#allocation33_spill] sm:$0xff] %v4318_v35  ;;  %v4322_v58 = vpop.eup %3086  ;;  %3106 = vpow2.f32 %v1547_v51  ;;  %v1555_v6 = vmul.f32 1.442695, %v1349_v3  ;;  %v1727_v37 = vadd.f32 %v4301_v29, %v1726_v23  ;;  %v1557_v18 = vmul.f32 1.442695, %v1350_v13  ;;  %v5126_v40 = vld [vmem:[#allocation38_spill] sm:$0xff] }
 0x2b2   : > { %5121 = vst [vmem:[#allocation35_spill] sm:$0xff] %v4322_v58  ;;  %v4325_v49 = vpop.eup %3088  ;;  %3108 = vpow2.f32 %v1549_v45  ;;  %v1215_v57 = vpop.xlane.xlu0 %1214  ;;  %v1731_v1 = vadd.f32 %v4313_v52, %v1730_v15  ;;  %v5128_v23 = vld [vmem:[#allocation41_spill] sm:$0xff] }
 0x2b3   : > { %5122 = vst [vmem:[#allocation36_spill] sm:$0xff] %v4325_v49  ;;  %v4328_v8 = vpop.eup %3090  ;;  %3110 = vpow2.f32 %v1551_v20  ;;  %1728 = vadd.xlane.f32.xlu0 %v1727_v37  ;;  %v1351_v0 = vsub.f32 %v5124_v25, %v1215_v57  ;;  %v1352_v41 = vsub.f32 %v5125_v42, %v1215_v57  ;;  %v1353_v51 = vsub.f32 %v5126_v40, %v1215_v57 }
 0x2b4   : > { %5123 = vst [vmem:[#allocation34_spill] sm:$0xff] %v4328_v8  ;;  %v4333_v3 = vpop.eup %3092  ;;  %3112 = vpow2.f32 %v1553_v27  ;;  %v1354_v36 = vsub.f32 %v5128_v23, %v1215_v57  ;;  %v1732_v13 = vadd.f32 %v4318_v35, %v1731_v1  ;;  %v1220_v45 = vpop.xlane.xlu1 %1219  ;;  %v1735_v15 = vadd.f32 %v4325_v49, %v4322_v58  ;;  %v5131_v27 = vld [vmem:[#allocation43_spill] sm:$0xff]  ;;  %v5132_v57 = vld [vmem:[#allocation44_spill] sm:$0xff]  ;;  %v5134_v35 = vld [vmem:[#allocation42_spill] sm:$0xff] }
 0x2b5   : > { %5127 = vst [vmem:[#allocation37_spill] sm:$0xff] %v4333_v3  ;;  %v4339_v52 = vpop.eup %3094  ;;  %3114 = vpow2.f32 %v1555_v6  ;;  %v1559_v20 = vmul.f32 1.442695, %v1351_v0  ;;  %v1561_v37 = vmul.f32 1.442695, %v1352_v41  ;;  %v1355_v29 = vsub.f32 %v5131_v27, %v1220_v45  ;;  %v5135_v58 = vld [vmem:[#allocation45_spill] sm:$0xff] }
 0x2b6   : > { %5129 = vst [vmem:[#allocation39_spill] sm:$0xff] %v4339_v52  ;;  %v1563_v25 = vmul.f32 1.442695, %v1353_v51  ;;  %v4341_v42 = vpop.eup %3096  ;;  %3116 = vpow2.f32 %v1557_v18  ;;  %v1565_v40 = vmul.f32 1.442695, %v1354_v36  ;;  %1733 = vadd.xlane.f32.xlu1 %v1732_v13  ;;  %v1356_v23 = vsub.f32 %v5132_v57, %v1220_v45  ;;  %v5141_v57 = vld [vmem:[#allocation48_spill] sm:$0xff] }
 0x2b7   : > { %5130 = vst [vmem:[#allocation40_spill] sm:$0xff] %v4341_v42  ;;  %v4345_v1 = vpop.eup %3098  ;;  %3118 = vpow2.f32 %v1559_v20  ;;  %v1357_v49 = vsub.f32 %v5134_v35, %v1220_v45  ;;  %v1358_v62 = vsub.f32 %v5135_v58, %v1220_v45  ;;  %v1736_v6 = vadd.f32 %v4328_v8, %v1735_v15 }
 0x2b8   : > { %5133 = vst [vmem:[#allocation38_spill] sm:$0xff] %v4345_v1  ;;  %v4350_v0 = vpop.eup %3100  ;;  %3120 = vpow2.f32 %v1561_v37  ;;  %v1567_v41 = vmul.f32 1.442695, %v1355_v29  ;;  %v1569_v18 = vmul.f32 1.442695, %v1356_v23  ;;  %v1740_v36 = vadd.f32 %v4341_v42, %v4339_v52  ;;  %v5140_v29 = vld [vmem:[#allocation47_spill] sm:$0xff] }
 0x2b9   : > { %5136 = vst [vmem:[#allocation41_spill] sm:$0xff] %v4350_v0  ;;  %v4354_v51 = vpop.eup %3102  ;;  %3122 = vpow2.f32 %v1563_v25  ;;  %v1571_v13 = vmul.f32 1.442695, %v1357_v49  ;;  %v1737_v20 = vadd.f32 %v4333_v3, %v1736_v6  ;;  %v1573_v35 = vmul.f32 1.442695, %v1358_v62  ;;  %v5142_v42 = vld [vmem:[#allocation46_spill] sm:$0xff] }
 0x2ba   : > { %5137 = vst [vmem:[#allocation43_spill] sm:$0xff] %v4354_v51  ;;  %v4357_v27 = vpop.eup %3104  ;;  %3124 = vpow2.f32 %v1565_v40  ;;  %v1225_v58 = vpop.xlane.xlu0 %1224  ;;  %v1741_v45 = vadd.f32 %v4345_v1, %v1740_v36  ;;  %v5144_v6 = vld [vmem:[#allocation49_spill] sm:$0xff] }
 0x2bb   : > { %5138 = vst [vmem:[#allocation44_spill] sm:$0xff] %v4357_v27  ;;  %v4360_v15 = vpop.eup %3106  ;;  %3126 = vpow2.f32 %v1567_v41  ;;  %1738 = vadd.xlane.f32.xlu0 %v1737_v20  ;;  %v1359_v37 = vsub.f32 %v5140_v29, %v1225_v58  ;;  %v1360_v23 = vsub.f32 %v5141_v57, %v1225_v58  ;;  %v1361_v25 = vsub.f32 %v5142_v42, %v1225_v58 }
 0x2bc   : > { %5139 = vst [vmem:[#allocation42_spill] sm:$0xff] %v4360_v15  ;;  %v4365_v49 = vpop.eup %3108  ;;  %3128 = vpow2.f32 %v1569_v18  ;;  %v1362_v52 = vsub.f32 %v5144_v6, %v1225_v58  ;;  %v1742_v62 = vadd.f32 %v4350_v0, %v1741_v45  ;;  %v1230_v40 = vpop.xlane.xlu1 %1229  ;;  %v1745_v36 = vadd.f32 %v4357_v27, %v4354_v51  ;;  %v5147_v18 = vld [vmem:[#allocation51_spill] sm:$0xff]  ;;  %v5148_v58 = vld [vmem:[#allocation52_spill] sm:$0xff]  ;;  %v5150_v0 = vld [vmem:[#allocation50_spill] sm:$0xff] }
 0x2bd   : > { %5143 = vst [vmem:[#allocation45_spill] sm:$0xff] %v4365_v49  ;;  %v4371_v1 = vpop.eup %3110  ;;  %3130 = vpow2.f32 %v1571_v13  ;;  %v1575_v41 = vmul.f32 1.442695, %v1359_v37  ;;  %v1577_v20 = vmul.f32 1.442695, %v1360_v23  ;;  %v1363_v3 = vsub.f32 %v5147_v18, %v1230_v40  ;;  %v5151_v51 = vld [vmem:[#allocation53_spill] sm:$0xff] }
 0x2be   : > { %5145 = vst [vmem:[#allocation47_spill] sm:$0xff] %v4371_v1  ;;  %v1579_v29 = vmul.f32 1.442695, %v1361_v25  ;;  %v4373_v57 = vpop.eup %3112  ;;  %3132 = vpow2.f32 %v1573_v35  ;;  %v1581_v42 = vmul.f32 1.442695, %v1362_v52  ;;  %1743 = vadd.xlane.f32.xlu1 %v1742_v62  ;;  %v1364_v6 = vsub.f32 %v5148_v58, %v1230_v40  ;;  %v5157_v58 = vld [vmem:[#allocation56_spill] sm:$0xff] }
 0x2bf   : > { %5146 = vst [vmem:[#allocation48_spill] sm:$0xff] %v4373_v57  ;;  %v4377_v45 = vpop.eup %3114  ;;  %3134 = vpow2.f32 %v1575_v41  ;;  %v1365_v27 = vsub.f32 %v5150_v0, %v1230_v40  ;;  %v1366_v8 = vsub.f32 %v5151_v51, %v1230_v40  ;;  %v1746_v13 = vadd.f32 %v4360_v15, %v1745_v36 }
 0x2c0   : > { %5149 = vst [vmem:[#allocation46_spill] sm:$0xff] %v4377_v45  ;;  %v4382_v37 = vpop.eup %3116  ;;  %3136 = vpow2.f32 %v1577_v20  ;;  %v1583_v23 = vmul.f32 1.442695, %v1363_v3  ;;  %v1585_v35 = vmul.f32 1.442695, %v1364_v6  ;;  %v1750_v52 = vadd.f32 %v4373_v57, %v4371_v1  ;;  %v5156_v3 = vld [vmem:[#allocation55_spill] sm:$0xff] }
 0x2c1   : > { %5152 = vst [vmem:[#allocation49_spill] sm:$0xff] %v4382_v37  ;;  %v4386_v25 = vpop.eup %3118  ;;  %3138 = vpow2.f32 %v1579_v29  ;;  %v1587_v62 = vmul.f32 1.442695, %v1365_v27  ;;  %v1747_v41 = vadd.f32 %v4365_v49, %v1746_v13  ;;  %v1589_v0 = vmul.f32 1.442695, %v1366_v8  ;;  %v5158_v57 = vld [vmem:[#allocation54_spill] sm:$0xff] }
 0x2c2   : > { %5153 = vst [vmem:[#allocation51_spill] sm:$0xff] %v4386_v25  ;;  %v4389_v18 = vpop.eup %3120  ;;  %3140 = vpow2.f32 %v1581_v42  ;;  %v1235_v51 = vpop.xlane.xlu0 %1234  ;;  %v1751_v40 = vadd.f32 %v4377_v45, %v1750_v52  ;;  %v5160_v13 = vld [vmem:[#allocation57_spill] sm:$0xff] }
 0x2c3   : > { %5154 = vst [vmem:[#allocation52_spill] sm:$0xff] %v4389_v18  ;;  %v4392_v36 = vpop.eup %3122  ;;  %3142 = vpow2.f32 %v1583_v23  ;;  %1748 = vadd.xlane.f32.xlu0 %v1747_v41  ;;  %v1367_v20 = vsub.f32 %v5156_v3, %v1235_v51  ;;  %v1368_v6 = vsub.f32 %v5157_v58, %v1235_v51  ;;  %v1369_v29 = vsub.f32 %v5158_v57, %v1235_v51 }
 0x2c4   : > { %5155 = vst [vmem:[#allocation50_spill] sm:$0xff] %v4392_v36  ;;  %v4397_v27 = vpop.eup %3124  ;;  %3144 = vpow2.f32 %v1585_v35  ;;  %v1370_v1 = vsub.f32 %v5160_v13, %v1235_v51  ;;  %v1752_v8 = vadd.f32 %v4382_v37, %v1751_v40  ;;  %v1240_v42 = vpop.xlane.xlu1 %1239  ;;  %v1755_v52 = vadd.f32 %v4389_v18, %v4386_v25  ;;  %v5163_v35 = vld [vmem:[#allocation59_spill] sm:$0xff]  ;;  %v5164_v51 = vld [vmem:[#allocation60_spill] sm:$0xff]  ;;  %v5166_v37 = vld [vmem:[#allocation58_spill] sm:$0xff] }
 0x2c5   : > { %5159 = vst [vmem:[#allocation53_spill] sm:$0xff] %v4397_v27  ;;  %v4403_v45 = vpop.eup %3126  ;;  %3146 = vpow2.f32 %v1587_v62  ;;  %v1591_v23 = vmul.f32 1.442695, %v1367_v20  ;;  %v1593_v41 = vmul.f32 1.442695, %v1368_v6  ;;  %v1371_v49 = vsub.f32 %v5163_v35, %v1240_v42  ;;  %v5167_v25 = vld [vmem:[#allocation61_spill] sm:$0xff] }
 0x2c6   : > { %5161 = vst [vmem:[#allocation55_spill] sm:$0xff] %v4403_v45  ;;  %v1595_v3 = vmul.f32 1.442695, %v1369_v29  ;;  %v4405_v58 = vpop.eup %3128  ;;  %3148 = vpow2.f32 %v1589_v0  ;;  %v1597_v57 = vmul.f32 1.442695, %v1370_v1  ;;  %1753 = vadd.xlane.f32.xlu1 %v1752_v8  ;;  %v1372_v13 = vsub.f32 %v5164_v51, %v1240_v42  ;;  %v5173_v51 = vld [vmem:[#allocation64_spill] sm:$0xff] }
 0x2c7   : > { %5162 = vst [vmem:[#allocation56_spill] sm:$0xff] %v4405_v58  ;;  %v4409_v40 = vpop.eup %3130  ;;  %3150 = vpow2.f32 %v1591_v23  ;;  %v1373_v18 = vsub.f32 %v5166_v37, %v1240_v42  ;;  %v1374_v15 = vsub.f32 %v5167_v25, %v1240_v42  ;;  %v1756_v62 = vadd.f32 %v4392_v36, %v1755_v52 }
 0x2c8   : > { %5165 = vst [vmem:[#allocation54_spill] sm:$0xff] %v4409_v40  ;;  %v4414_v20 = vpop.eup %3132  ;;  %3152 = vpow2.f32 %v1593_v41  ;;  %v1599_v6 = vmul.f32 1.442695, %v1371_v49  ;;  %v1601_v0 = vmul.f32 1.442695, %v1372_v13  ;;  %v1760_v1 = vadd.f32 %v4405_v58, %v4403_v45  ;;  %v5172_v49 = vld [vmem:[#allocation63_spill] sm:$0xff] }
 0x2c9   : > { %5168 = vst [vmem:[#allocation57_spill] sm:$0xff] %v4414_v20  ;;  %v4418_v29 = vpop.eup %3134  ;;  %3154 = vpow2.f32 %v1595_v3  ;;  %v1603_v8 = vmul.f32 1.442695, %v1373_v18  ;;  %v1757_v23 = vadd.f32 %v4397_v27, %v1756_v62  ;;  %v1605_v37 = vmul.f32 1.442695, %v1374_v15  ;;  %v5174_v58 = vld [vmem:[#allocation62_spill] sm:$0xff] }
 0x2ca   : > { %5169 = vst [vmem:[#allocation59_spill] sm:$0xff] %v4418_v29  ;;  %v4421_v35 = vpop.eup %3136  ;;  %3156 = vpow2.f32 %v1597_v57  ;;  %v1245_v25 = vpop.xlane.xlu0 %1244  ;;  %v1761_v42 = vadd.f32 %v4409_v40, %v1760_v1  ;;  %v5176_v62 = vld [vmem:[#allocation65_spill] sm:$0xff] }
 0x2cb   : > { %5170 = vst [vmem:[#allocation60_spill] sm:$0xff] %v4421_v35  ;;  %v4424_v52 = vpop.eup %3138  ;;  %3158 = vpow2.f32 %v1599_v6  ;;  %1758 = vadd.xlane.f32.xlu0 %v1757_v23  ;;  %v1375_v41 = vsub.f32 %v5172_v49, %v1245_v25  ;;  %v1376_v13 = vsub.f32 %v5173_v51, %v1245_v25  ;;  %v1377_v3 = vsub.f32 %v5174_v58, %v1245_v25 }
 0x2cc   : > { %5171 = vst [vmem:[#allocation58_spill] sm:$0xff] %v4424_v52  ;;  %v4429_v18 = vpop.eup %3140  ;;  %3160 = vpow2.f32 %v1601_v0  ;;  %v1378_v45 = vsub.f32 %v5176_v62, %v1245_v25  ;;  %v1762_v15 = vadd.f32 %v4414_v20, %v1761_v42  ;;  %v1250_v57 = vpop.xlane.xlu1 %1249  ;;  %v1765_v1 = vadd.f32 %v4421_v35, %v4418_v29  ;;  %v5179_v0 = vld [vmem:[#allocation67_spill] sm:$0xff]  ;;  %v5180_v25 = vld [vmem:[#allocation68_spill] sm:$0xff]  ;;  %v5182_v20 = vld [vmem:[#allocation66_spill] sm:$0xff] }
 0x2cd   : > { %5175 = vst [vmem:[#allocation61_spill] sm:$0xff] %v4429_v18  ;;  %v4435_v40 = vpop.eup %3142  ;;  %3162 = vpow2.f32 %v1603_v8  ;;  %v1607_v6 = vmul.f32 1.442695, %v1375_v41  ;;  %v1609_v23 = vmul.f32 1.442695, %v1376_v13  ;;  %v1379_v27 = vsub.f32 %v5179_v0, %v1250_v57  ;;  %v5183_v29 = vld [vmem:[#allocation69_spill] sm:$0xff] }
 0x2ce   : > { %5177 = vst [vmem:[#allocation63_spill] sm:$0xff] %v4435_v40  ;;  %v1611_v49 = vmul.f32 1.442695, %v1377_v3  ;;  %v4437_v51 = vpop.eup %3144  ;;  %3164 = vpow2.f32 %v1605_v37  ;;  %v1613_v58 = vmul.f32 1.442695, %v1378_v45  ;;  %1763 = vadd.xlane.f32.xlu1 %v1762_v15  ;;  %v1380_v62 = vsub.f32 %v5180_v25, %v1250_v57  ;;  %v5188_v25 = vld [vmem:[#allocation72_spill] sm:$0xff] }
 0x2cf   : > { %5178 = vst [vmem:[#allocation64_spill] sm:$0xff] %v4437_v51  ;;  %v4441_v42 = vpop.eup %3146  ;;  %3166 = vpow2.f32 %v1607_v6  ;;  %v1381_v35 = vsub.f32 %v5182_v20, %v1250_v57  ;;  %v1382_v36 = vsub.f32 %v5183_v29, %v1250_v57  ;;  %v1766_v8 = vadd.f32 %v4424_v52, %v1765_v1 }
 0x2d0   : > { %5181 = vst [vmem:[#allocation62_spill] sm:$0xff] %v4441_v42  ;;  %v4446_v41 = vpop.eup %3148  ;;  %3168 = vpow2.f32 %v1609_v23  ;;  %v1615_v13 = vmul.f32 1.442695, %v1379_v27  ;;  %v1617_v37 = vmul.f32 1.442695, %v1380_v62  ;;  %v1770_v45 = vadd.f32 %v4437_v51, %v4435_v40  ;;  %v5187_v27 = vld [vmem:[#allocation71_spill] sm:$0xff] }
 0x2d1   : > { %5184 = vst [vmem:[#allocation65_spill] sm:$0xff] %v4446_v41  ;;  %v4450_v3 = vpop.eup %3150  ;;  %3170 = vpow2.f32 %v1611_v49  ;;  %v1619_v15 = vmul.f32 1.442695, %v1381_v35  ;;  %v1767_v6 = vadd.f32 %v4429_v18, %v1766_v8  ;;  %v1621_v20 = vmul.f32 1.442695, %v1382_v36  ;;  %v5189_v51 = vld [vmem:[#allocation70_spill] sm:$0xff] }
 0x2d2   : > { %5185 = vst [vmem:[#allocation67_spill] sm:$0xff] %v4450_v3  ;;  %v4453_v0 = vpop.eup %3152  ;;  %3172 = vpow2.f32 %v1613_v58  ;;  %v1255_v29 = vpop.xlane.xlu0 %1254  ;;  %v1771_v57 = vadd.f32 %v4441_v42, %v1770_v45  ;;  %v5190_v8 = vld [vmem:[#allocation73_spill] sm:$0xff] }
 0x2d3   : > { %5186 = vst [vmem:[#allocation68_spill] sm:$0xff] %v4453_v0  ;;  %v4456_v1 = vpop.eup %3154  ;;  %3174 = vpow2.f32 %v1615_v13  ;;  %1768 = vadd.xlane.f32.xlu0 %v1767_v6  ;;  %v1383_v23 = vsub.f32 %v5187_v27, %v1255_v29  ;;  %v1384_v62 = vsub.f32 %v5188_v25, %v1255_v29  ;;  %v1385_v49 = vsub.f32 %v5189_v51, %v1255_v29 }
 0x2d4   : > { %v4461_v35 = vpop.eup %3156  ;;  %3176 = vpow2.f32 %v1617_v37  ;;  %v1386_v40 = vsub.f32 %v5190_v8, %v1255_v29  ;;  %v1772_v36 = vadd.f32 %v4446_v41, %v1771_v57  ;;  %v1260_v58 = vpop.xlane.xlu1 %1259  ;;  %v1775_v45 = vadd.f32 %v4453_v0, %v4450_v3  ;;  %v5193_v37 = vld [vmem:[#allocation75_spill] sm:$0xff]  ;;  %v5194_v29 = vld [vmem:[#allocation76_spill] sm:$0xff]  ;;  %v5196_v41 = vld [vmem:[#allocation74_spill] sm:$0xff] }
 0x2d5   : > { %v4467_v42 = vpop.eup %3158  ;;  %3178 = vpow2.f32 %v1619_v15  ;;  %v1623_v13 = vmul.f32 1.442695, %v1383_v23  ;;  %v1625_v6 = vmul.f32 1.442695, %v1384_v62  ;;  %v1627_v27 = vmul.f32 1.442695, %v1385_v49 }
 0x2d6   : > { %5191 = vst [vmem:[#allocation66_spill] sm:$0xff] %v4467_v42  ;;  %v4469_v25 = vpop.eup %3160  ;;  %3180 = vpow2.f32 %v1621_v20  ;;  %v1629_v51 = vmul.f32 1.442695, %v1386_v40  ;;  %1773 = vadd.xlane.f32.xlu1 %v1772_v36  ;;  %v1387_v18 = vsub.f32 %v5193_v37, %v1260_v58  ;;  %v1388_v8 = vsub.f32 %v5194_v29, %v1260_v58  ;;  %v5197_v3 = vld [vmem:[#allocation77_spill] sm:$0xff]  ;;  %v5201_v29 = vld [vmem:[#allocation80_spill] sm:$0xff] }
 0x2d7   : > { %5192 = vst [vmem:[#allocation69_spill] sm:$0xff] %v4469_v25  ;;  %v4473_v57 = vpop.eup %3162  ;;  %3182 = vpow2.f32 %v1623_v13  ;;  %v1389_v0 = vsub.f32 %v5196_v41, %v1260_v58  ;;  %v1390_v52 = vsub.f32 %v5197_v3, %v1260_v58  ;;  %v1776_v15 = vadd.f32 %v4456_v1, %v1775_v45 }
 0x2d8   : > { %5195 = vst [vmem:[#allocation71_spill] sm:$0xff] %v4473_v57  ;;  %v4478_v23 = vpop.eup %3164  ;;  %3184 = vpow2.f32 %v1625_v6  ;;  %v1631_v62 = vmul.f32 1.442695, %v1387_v18  ;;  %v1633_v20 = vmul.f32 1.442695, %v1388_v8  ;;  %v1780_v40 = vadd.f32 %v4469_v25, %v4467_v42  ;;  %v5200_v18 = vld [vmem:[#allocation79_spill] sm:$0xff] }
 0x2d9   : > { %v4482_v49 = vpop.eup %3166  ;;  %3186 = vpow2.f32 %v1627_v27  ;;  %v1635_v36 = vmul.f32 1.442695, %v1389_v0  ;;  %v1777_v13 = vadd.f32 %v4461_v35, %v1776_v15  ;;  %v1637_v41 = vmul.f32 1.442695, %v1390_v52  ;;  %v5202_v25 = vld [vmem:[#allocation78_spill] sm:$0xff] }
 0x2da   : > { %5198 = vst [vmem:[#allocation72_spill] sm:$0xff] %v4482_v49  ;;  %v4485_v37 = vpop.eup %3168  ;;  %3188 = vpow2.f32 %v1629_v51  ;;  %v1265_v3 = vpop.xlane.xlu0 %1264  ;;  %v1781_v58 = vadd.f32 %v4473_v57, %v1780_v40 }
 0x2db   : > { %5199 = vst [vmem:[#allocation70_spill] sm:$0xff] %v4485_v37  ;;  %v4488_v45 = vpop.eup %3170  ;;  %3190 = vpow2.f32 %v1631_v62  ;;  %1778 = vadd.xlane.f32.xlu0 %v1777_v13  ;;  %v1391_v6 = vsub.f32 %v5200_v18, %v1265_v3  ;;  %v1392_v8 = vsub.f32 %v5201_v29, %v1265_v3  ;;  %v1393_v27 = vsub.f32 %v5202_v25, %v1265_v3 }
 0x2dc   : > { %v4493_v0 = vpop.eup %3172  ;;  %3192 = vpow2.f32 %v1633_v20  ;;  %v1394_v15 = vsub.f32 %v4035_v54, %v1265_v3  ;;  %v1782_v52 = vadd.f32 %v4478_v23, %v1781_v58  ;;  %v1270_v51 = vpop.xlane.xlu1 %1269  ;;  %v1785_v40 = vadd.f32 %v4485_v37, %v4482_v49  ;;  %v5203_v20 = vld [vmem:[#allocation81_spill] sm:$0xff]  ;;  %v5204_v54 = vld [vmem:[#allocation82_spill] sm:$0xff] }
 0x2dd   : > { %v4499_v57 = vpop.eup %3174  ;;  %3194 = vpow2.f32 %v1635_v36  ;;  %v1639_v62 = vmul.f32 1.442695, %v1391_v6  ;;  %v1641_v13 = vmul.f32 1.442695, %v1392_v8  ;;  %v1643_v18 = vmul.f32 1.442695, %v1393_v27 }
 0x2de   : > { %v4501_v29 = vpop.eup %3176  ;;  %3196 = vpow2.f32 %v1637_v41  ;;  %v1645_v25 = vmul.f32 1.442695, %v1394_v15  ;;  %1783 = vadd.xlane.f32.xlu1 %v1782_v52  ;;  %v1395_v42 = vsub.f32 %v5203_v20, %v1270_v51  ;;  %v1396_v3 = vsub.f32 %v5204_v54, %v1270_v51 }
 0x2df   : > { %v4505_v58 = vpop.eup %3178  ;;  %3198 = vpow2.f32 %v1639_v62  ;;  %v1397_v37 = vsub.f32 %v4039_v9, %v1270_v51  ;;  %v1398_v49 = vsub.f32 %v4045_v12, %v1270_v51  ;;  %v1786_v36 = vadd.f32 %v4488_v45, %v1785_v40 }
 0x2e0   : > { %v4510_v6 = vpop.eup %3180  ;;  %3200 = vpow2.f32 %v1641_v13  ;;  %v1647_v8 = vmul.f32 1.442695, %v1395_v42  ;;  %v1649_v41 = vmul.f32 1.442695, %v1396_v3  ;;  %v1790_v27 = vadd.f32 %v4501_v29, %v4499_v57 }
 0x2e1   : > { %v4514_v15 = vpop.eup %3182  ;;  %3202 = vpow2.f32 %v1643_v18  ;;  %v1787_v52 = vadd.f32 %v4493_v0, %v1786_v36  ;;  %v1651_v9 = vmul.f32 1.442695, %v1397_v37  ;;  %v1653_v13 = vmul.f32 1.442695, %v1398_v49 }
 0x2e2   : > { %v4517_v62 = vpop.eup %3184  ;;  %3204 = vpow2.f32 %v1645_v25  ;;  %v1791_v12 = vadd.f32 %v4505_v58, %v1790_v27 }
 0x2e3   : > { %v4520_v51 = vpop.eup %3186  ;;  %3206 = vpow2.f32 %v1647_v8  ;;  %1788 = vadd.xlane.f32.xlu0 %v1787_v52  ;;  %v1795_v42 = vadd.f32 %v4517_v62, %v4514_v15 }
 0x2e4   : > { %v4524_v40 = vpop.eup %3188  ;;  %3208 = vpow2.f32 %v1649_v41  ;;  %v1792_v18 = vadd.f32 %v4510_v6, %v1791_v12 }
 0x2e5   : > { %v4527_v20 = vpop.eup %3190  ;;  %v1796_v25 = vadd.f32 %v4520_v51, %v1795_v42  ;;  %3210 = vpow2.f32 %v1651_v9 }
 0x2e6   : > { %v4530_v37 = vpop.eup %3192  ;;  %1793 = vadd.xlane.f32.xlu1 %v1792_v18  ;;  %3212 = vpow2.f32 %v1653_v13 }
 0x2e7   : > { %v4532_v54 = vpop.eup %3194  ;;  %v1797_v3 = vadd.f32 %v4524_v40, %v1796_v25  ;;  %v1800_v36 = vadd.f32 %v4530_v37, %v4527_v20 }
 0x2e8   : > { %v4537_v8 = vpop.eup %3196 }
 0x2e9   : > { %5205 = vst [vmem:[#allocation73_spill] sm:$0xff] %v4537_v8  ;;  %v4539_v49 = vpop.eup %3198  ;;  %1798 = vadd.xlane.f32.xlu0 %v1797_v3  ;;  %v1801_v41 = vadd.f32 %v4532_v54, %v1800_v36 }
 0x2ea   : > { %5206 = vst [vmem:[#allocation75_spill] sm:$0xff] %v4539_v49  ;;  %v4542_v27 = vpop.eup %3200 }
 0x2eb   : > { %5207 = vst [vmem:[#allocation76_spill] sm:$0xff] %v4542_v27  ;;  %v4544_v52 = vpop.eup %3202  ;;  %v1802_v9 = vadd.f32 %v4537_v8, %v1801_v41  ;;  %v1805_v12 = vadd.f32 %v4542_v27, %v4539_v49 }
 0x2ec   : > { %5208 = vst [vmem:[#allocation74_spill] sm:$0xff] %v4544_v52  ;;  %v4549_v42 = vpop.eup %3204 }
 0x2ed   : > { %5209 = vst [vmem:[#allocation77_spill] sm:$0xff] %v4549_v42  ;;  %v4551_v18 = vpop.eup %3206  ;;  %1803 = vadd.xlane.f32.xlu1 %v1802_v9  ;;  %v1806_v13 = vadd.f32 %v4544_v52, %v1805_v12 }
 0x2ee   : > { %5210 = vst [vmem:[#allocation79_spill] sm:$0xff] %v4551_v18  ;;  %v4554_v25 = vpop.eup %3208 }
 0x2ef   : > { %5211 = vst [vmem:[#allocation80_spill] sm:$0xff] %v4554_v25  ;;  %v1807_v3 = vadd.f32 %v4549_v42, %v1806_v13  ;;  %v1810_v36 = vadd.f32 %v4554_v25, %v4551_v18  ;;  %v4559_v41 = vpop.eup %3210 }
 0x2f0   : > { %5212 = vst [vmem:[#allocation78_spill] sm:$0xff] %v4559_v41  ;;  %v4562_v49 = vpop.eup %3212 }
 0x2f1   : > { %1808 = vadd.xlane.f32.xlu0 %v1807_v3  ;;  %v1811_v27 = vadd.f32 %v4559_v41, %v1810_v36  ;;  %5213 = vst [vmem:[#allocation81_spill] sm:$0xff] %v4562_v49 }
 0x2f3   : > { %v1812_v8 = vadd.f32 %v4562_v49, %v1811_v27 }
 0x2f5   : > { %1813 = vadd.xlane.f32.xlu1 %v1812_v8 }
 0x308   : > { %v1659_v9 = vpop.xlane.xlu0 %1658 }
 0x309   : > { %3214 = vrcp.f32 %v1659_v9 }
 0x30b   : > { %v1664_v12 = vpop.xlane.xlu1 %1663 }
 0x30c   : > { %3216 = vrcp.f32 %v1664_v12 }
 0x310   : > { %v1669_v52 = vpop.xlane.xlu0 %1668 }
 0x311   : > { %3218 = vrcp.f32 %v1669_v52 }
 0x313   : > { %v3215_v13 = vpop.eup %3214  ;;  %v1674_v25 = vpop.xlane.xlu1 %1673 }
 0x314   : > { %v1879_v3 = vmul.f32 %v3215_v13, %v4069_v16  ;;  %v1880_v36 = vmul.f32 %v3215_v13, %v4071_v26  ;;  %v1881_v41 = vmul.f32 %v3215_v13, %v4073_v47  ;;  %v1882_v27 = vmul.f32 %v3215_v13, %v4078_v22 }
 0x315   : > { %3220 = vrcp.f32 %v1674_v25 }
 0x316   : > { %v3217_v8 = vpop.eup %3216  ;;  %v2718_v9 = vpack.c.bf16 %v1880_v36, %v1879_v3  ;;  %v2719_v49 = vpack.c.bf16 %v1882_v27, %v1881_v41 }
 0x317   : > { %v1883_v12 = vmul.f32 %v3217_v8, %v4083_v4  ;;  %v1884_v52 = vmul.f32 %v3217_v8, %v4085_v28  ;;  %v1885_v18 = vmul.f32 %v3217_v8, %v4089_v7  ;;  %v1886_v42 = vmul.f32 %v3217_v8, %v4094_v48 }
 0x318   : > { %2391 = vst [vmem:[%s4576_s30] sm:$0xff] %v2718_v9  ;;  %2392 = vst [vmem:[%s4576_s30 + $0x8] sm:$0xff] %v2719_v49  ;;  %v1679_v16 = vpop.xlane.xlu0 %1678 }
 0x319   : > { %v2720_v26 = vpack.c.bf16 %v1884_v52, %v1883_v12  ;;  %v2721_v47 = vpack.c.bf16 %v1886_v42, %v1885_v18  ;;  %3222 = vrcp.f32 %v1679_v16 }
 0x31b   : > { %v3219_v22 = vpop.eup %3218  ;;  %2393 = vst [vmem:[%s4576_s30 + $0x10] sm:$0xff] %v2720_v26  ;;  %2394 = vst [vmem:[%s4576_s30 + $0x18] sm:$0xff] %v2721_v47  ;;  %v1684_v4 = vpop.xlane.xlu1 %1683 }
 0x31c   : > { %v1887_v28 = vmul.f32 %v3219_v22, %v4098_v33  ;;  %v1888_v7 = vmul.f32 %v3219_v22, %v4101_v14  ;;  %v1889_v48 = vmul.f32 %v3219_v22, %v4104_v17  ;;  %v1890_v25 = vmul.f32 %v3219_v22, %v4109_v56 }
 0x31d   : > { %3224 = vrcp.f32 %v1684_v4 }
 0x31e   : > { %v2722_v49 = vpack.c.bf16 %v1888_v7, %v1887_v28  ;;  %v2723_v41 = vpack.c.bf16 %v1890_v25, %v1889_v48 }
 0x31f   : > { %v3221_v13 = vpop.eup %3220 }
 0x320   : > { %2395 = vst [vmem:[%s4576_s30 + $0x20] sm:$0xff] %v2722_v49  ;;  %2396 = vst [vmem:[%s4576_s30 + $0x28] sm:$0xff] %v2723_v41  ;;  %v1891_v42 = vmul.f32 %v3221_v13, %v4115_v61  ;;  %v1892_v18 = vmul.f32 %v3221_v13, %v4117_v44  ;;  %v1893_v33 = vmul.f32 %v3221_v13, %v4121_v53  ;;  %v1689_v3 = vpop.xlane.xlu0 %1688 }
 0x321   : > { %v1894_v14 = vmul.f32 %v3221_v13, %v4126_v31  ;;  %3226 = vrcp.f32 %v1689_v3  ;;  %v5215_v3 = vld [vmem:[#allocation7_spill] sm:$0xff] }
 0x322   : > { %v2724_v17 = vpack.c.bf16 %v1892_v18, %v1891_v42  ;;  %v5214_v18 = vld [vmem:[#allocation5_spill] sm:$0xff] }
 0x323   : > { %v2725_v56 = vpack.c.bf16 %v1894_v14, %v1893_v33  ;;  %v3223_v36 = vpop.eup %3222  ;;  %v1694_v27 = vpop.xlane.xlu1 %1693 }
 0x324   : > { %2397 = vst [vmem:[%s4576_s30 + $0x30] sm:$0xff] %v2724_v17  ;;  %v1895_v8 = vmul.f32 %v3223_v36, %v4130_v10  ;;  %v1896_v61 = vmul.f32 %v3223_v36, %v4133_v43  ;;  %v1897_v44 = vmul.f32 %v3223_v36, %v4136_v55  ;;  %v1898_v53 = vmul.f32 %v3223_v36, %v4141_v63 }
 0x325   : > { %2398 = vst [vmem:[%s4576_s30 + $0x38] sm:$0xff] %v2725_v56  ;;  %3228 = vrcp.f32 %v1694_v27  ;;  %v5216_v56 = vld [vmem:[#allocation8_spill] sm:$0xff]  ;;  %v5217_v27 = vld [vmem:[#allocation6_spill] sm:$0xff] }
 0x326   : > { %v2726_v31 = vpack.c.bf16 %v1896_v61, %v1895_v8  ;;  %v2727_v9 = vpack.c.bf16 %v1898_v53, %v1897_v44  ;;  %v5218_v8 = vld [vmem:[#allocation9_spill] sm:$0xff] }
 0x327   : > { %v3225_v12 = vpop.eup %3224 }
 0x328   : > { %2399 = vst [vmem:[%s4576_s30 + $0x40] sm:$0xff] %v2726_v31  ;;  %2400 = vst [vmem:[%s4576_s30 + $0x48] sm:$0xff] %v2727_v9  ;;  %v1899_v52 = vmul.f32 %v3225_v12, %v4147_v21  ;;  %v1900_v16 = vmul.f32 %v3225_v12, %v4149_v60  ;;  %v1901_v10 = vmul.f32 %v3225_v12, %v4153_v59  ;;  %v1699_v26 = vpop.xlane.xlu0 %1698  ;;  %v5219_v9 = vld [vmem:[#allocation11_spill] sm:$0xff] }
 0x329   : > { %v1902_v43 = vmul.f32 %v3225_v12, %v4158_v30  ;;  %3230 = vrcp.f32 %v1699_v26  ;;  %v5222_v26 = vld [vmem:[#allocation13_spill] sm:$0xff] }
 0x32a   : > { %v2728_v55 = vpack.c.bf16 %v1900_v16, %v1899_v52  ;;  %v5220_v52 = vld [vmem:[#allocation12_spill] sm:$0xff] }
 0x32b   : > { %v2729_v63 = vpack.c.bf16 %v1902_v43, %v1901_v10  ;;  %v3227_v47 = vpop.eup %3226  ;;  %v1704_v22 = vpop.xlane.xlu1 %1703  ;;  %v5221_v10 = vld [vmem:[#allocation10_spill] sm:$0xff] }
 0x32c   : > { %2401 = vst [vmem:[%s4576_s30 + $0x50] sm:$0xff] %v2728_v55  ;;  %v1903_v4 = vmul.f32 %v3227_v47, %v4162_v46  ;;  %v1904_v21 = vmul.f32 %v3227_v47, %v4165_v50  ;;  %v1905_v60 = vmul.f32 %v3227_v47, %v4168_v11  ;;  %v1906_v59 = vmul.f32 %v3227_v47, %v4173_v34 }
 0x32d   : > { %2402 = vst [vmem:[%s4576_s30 + $0x58] sm:$0xff] %v2729_v63  ;;  %3232 = vrcp.f32 %v1704_v22 }
 0x32e   : > { %v2730_v30 = vpack.c.bf16 %v1904_v21, %v1903_v4  ;;  %v2731_v28 = vpack.c.bf16 %v1906_v59, %v1905_v60  ;;  %v5223_v4 = vld [vmem:[#allocation15_spill] sm:$0xff]  ;;  %v5224_v60 = vld [vmem:[#allocation16_spill] sm:$0xff] }
 0x32f   : > { %v3229_v7 = vpop.eup %3228 }
 0x330   : > { %2403 = vst [vmem:[%s4576_s30 + $0x60] sm:$0xff] %v2730_v30  ;;  %2404 = vst [vmem:[%s4576_s30 + $0x68] sm:$0xff] %v2731_v28  ;;  %v1907_v48 = vmul.f32 %v3229_v7, %v4179_v19  ;;  %v1908_v25 = vmul.f32 %v3229_v7, %v4181_v24  ;;  %v1909_v46 = vmul.f32 %v3229_v7, %v4185_v39  ;;  %v1709_v49 = vpop.xlane.xlu0 %1708  ;;  %v5225_v30 = vld [vmem:[#allocation14_spill] sm:$0xff] }
 0x331   : > { %v1910_v50 = vmul.f32 %v3229_v7, %v4190_v38  ;;  %3234 = vrcp.f32 %v1709_v49  ;;  %v5226_v7 = vld [vmem:[#allocation17_spill] sm:$0xff] }
 0x332   : > { %v2732_v11 = vpack.c.bf16 %v1908_v25, %v1907_v48 }
 0x333   : > { %v2733_v34 = vpack.c.bf16 %v1910_v50, %v1909_v46  ;;  %v3231_v41 = vpop.eup %3230  ;;  %v1714_v13 = vpop.xlane.xlu1 %1713 }
 0x334   : > { %2405 = vst [vmem:[%s4576_s30 + $0x70] sm:$0xff] %v2732_v11  ;;  %v1911_v42 = vmul.f32 %v3231_v41, %v4194_v32  ;;  %v1912_v19 = vmul.f32 %v3231_v41, %v4197_v2  ;;  %v1913_v24 = vmul.f32 %v3231_v41, %v4200_v5  ;;  %v1914_v39 = vmul.f32 %v3231_v41, %v5214_v18  ;;  %v5230_v18 = vld [vmem:[#allocation21_spill] sm:$0xff] }
 0x335   : > { %2406 = vst [vmem:[%s4576_s30 + $0x78] sm:$0xff] %v2733_v34  ;;  %3236 = vrcp.f32 %v1714_v13  ;;  %v5227_v34 = vld [vmem:[#allocation19_spill] sm:$0xff]  ;;  %v5228_v13 = vld [vmem:[#allocation20_spill] sm:$0xff] }
 0x336   : > { %v2734_v38 = vpack.c.bf16 %v1912_v19, %v1911_v42  ;;  %v2735_v33 = vpack.c.bf16 %v1914_v39, %v1913_v24  ;;  %v5229_v19 = vld [vmem:[#allocation18_spill] sm:$0xff] }
 0x337   : > { %v3233_v14 = vpop.eup %3232 }
 0x338   : > { %2407 = vst [vmem:[%s4576_s30 + $0x80] sm:$0xff] %v2734_v38  ;;  %2408 = vst [vmem:[%s4576_s30 + $0x88] sm:$0xff] %v2735_v33  ;;  %v1915_v17 = vmul.f32 %v3233_v14, %v5215_v3  ;;  %v1916_v36 = vmul.f32 %v3233_v14, %v5216_v56  ;;  %v1917_v32 = vmul.f32 %v3233_v14, %v5217_v27  ;;  %v1719_v61 = vpop.xlane.xlu0 %1718  ;;  %v5231_v3 = vld [vmem:[#allocation23_spill] sm:$0xff]  ;;  %v5232_v56 = vld [vmem:[#allocation24_spill] sm:$0xff] }
 0x339   : > { %v1918_v2 = vmul.f32 %v3233_v14, %v5218_v8  ;;  %3238 = vrcp.f32 %v1719_v61  ;;  %v5233_v27 = vld [vmem:[#allocation22_spill] sm:$0xff]  ;;  %v5234_v8 = vld [vmem:[#allocation25_spill] sm:$0xff] }
 0x33a   : > { %v2736_v5 = vpack.c.bf16 %v1916_v36, %v1915_v17 }
 0x33b   : > { %v2737_v44 = vpack.c.bf16 %v1918_v2, %v1917_v32  ;;  %v3235_v53 = vpop.eup %3234  ;;  %v1724_v31 = vpop.xlane.xlu1 %1723 }
 0x33c   : > { %2409 = vst [vmem:[%s4576_s30 + $0x90] sm:$0xff] %v2736_v5  ;;  %v1919_v12 = vmul.f32 %v3235_v53, %v5219_v9  ;;  %v1920_v16 = vmul.f32 %v3235_v53, %v5220_v52  ;;  %v1921_v43 = vmul.f32 %v3235_v53, %v5221_v10  ;;  %v1922_v55 = vmul.f32 %v3235_v53, %v5222_v26  ;;  %v5235_v9 = vld [vmem:[#allocation27_spill] sm:$0xff]  ;;  %v5236_v52 = vld [vmem:[#allocation28_spill] sm:$0xff]  ;;  %v5237_v10 = vld [vmem:[#allocation26_spill] sm:$0xff] }
 0x33d   : > { %2410 = vst [vmem:[%s4576_s30 + $0x98] sm:$0xff] %v2737_v44  ;;  %3240 = vrcp.f32 %v1724_v31  ;;  %v5238_v26 = vld [vmem:[#allocation29_spill] sm:$0xff] }
 0x33e   : > { %v2738_v63 = vpack.c.bf16 %v1920_v16, %v1919_v12  ;;  %v2739_v47 = vpack.c.bf16 %v1922_v55, %v1921_v43 }
 0x33f   : > { %v3237_v22 = vpop.eup %3236 }
 0x340   : > { %2411 = vst [vmem:[%s4576_s30 + $0xa0] sm:$0xff] %v2738_v63  ;;  %2412 = vst [vmem:[%s4576_s30 + $0xa8] sm:$0xff] %v2739_v47  ;;  %v1923_v21 = vmul.f32 %v3237_v22, %v5223_v4  ;;  %v1924_v59 = vmul.f32 %v3237_v22, %v5224_v60  ;;  %v1925_v28 = vmul.f32 %v3237_v22, %v5225_v30  ;;  %v1729_v25 = vpop.xlane.xlu0 %1728  ;;  %v5239_v4 = vld [vmem:[#allocation31_spill] sm:$0xff]  ;;  %v5240_v60 = vld [vmem:[#allocation32_spill] sm:$0xff] }
 0x341   : > { %v1926_v48 = vmul.f32 %v3237_v22, %v5226_v7  ;;  %3242 = vrcp.f32 %v1729_v25  ;;  %v5241_v30 = vld [vmem:[#allocation30_spill] sm:$0xff]  ;;  %v5242_v7 = vld [vmem:[#allocation33_spill] sm:$0xff] }
 0x342   : > { %v2740_v46 = vpack.c.bf16 %v1924_v59, %v1923_v21 }
 0x343   : > { %v2741_v50 = vpack.c.bf16 %v1926_v48, %v1925_v28  ;;  %v3239_v49 = vpop.eup %3238  ;;  %v1734_v11 = vpop.xlane.xlu1 %1733 }
 0x344   : > { %2413 = vst [vmem:[%s4576_s30 + $0xb0] sm:$0xff] %v2740_v46  ;;  %v1927_v41 = vmul.f32 %v3239_v49, %v5227_v34  ;;  %v1928_v42 = vmul.f32 %v3239_v49, %v5228_v13  ;;  %v1929_v24 = vmul.f32 %v3239_v49, %v5229_v19  ;;  %v1930_v39 = vmul.f32 %v3239_v49, %v5230_v18  ;;  %v5243_v34 = vld [vmem:[#allocation35_spill] sm:$0xff]  ;;  %v5244_v13 = vld [vmem:[#allocation36_spill] sm:$0xff]  ;;  %v5245_v19 = vld [vmem:[#allocation34_spill] sm:$0xff] }
 0x345   : > { %2414 = vst [vmem:[%s4576_s30 + $0xb8] sm:$0xff] %v2741_v50  ;;  %3244 = vrcp.f32 %v1734_v11  ;;  %v5246_v18 = vld [vmem:[#allocation37_spill] sm:$0xff] }
 0x346   : > { %v2742_v38 = vpack.c.bf16 %v1928_v42, %v1927_v41  ;;  %v2743_v33 = vpack.c.bf16 %v1930_v39, %v1929_v24 }
 0x347   : > { %v3241_v14 = vpop.eup %3240 }
 0x348   : > { %2415 = vst [vmem:[%s4576_s30 + $0xc0] sm:$0xff] %v2742_v38  ;;  %2416 = vst [vmem:[%s4576_s30 + $0xc8] sm:$0xff] %v2743_v33  ;;  %v1931_v17 = vmul.f32 %v3241_v14, %v5231_v3  ;;  %v1932_v36 = vmul.f32 %v3241_v14, %v5232_v56  ;;  %v1933_v32 = vmul.f32 %v3241_v14, %v5233_v27  ;;  %v1739_v61 = vpop.xlane.xlu0 %1738  ;;  %v5247_v3 = vld [vmem:[#allocation39_spill] sm:$0xff]  ;;  %v5248_v56 = vld [vmem:[#allocation40_spill] sm:$0xff] }
 0x349   : > { %v1934_v2 = vmul.f32 %v3241_v14, %v5234_v8  ;;  %3246 = vrcp.f32 %v1739_v61  ;;  %v5249_v27 = vld [vmem:[#allocation38_spill] sm:$0xff]  ;;  %v5250_v8 = vld [vmem:[#allocation41_spill] sm:$0xff] }
 0x34a   : > { %v2744_v5 = vpack.c.bf16 %v1932_v36, %v1931_v17 }
 0x34b   : > { %v2745_v44 = vpack.c.bf16 %v1934_v2, %v1933_v32  ;;  %v3243_v53 = vpop.eup %3242  ;;  %v1744_v31 = vpop.xlane.xlu1 %1743 }
 0x34c   : > { %2417 = vst [vmem:[%s4576_s30 + $0xd0] sm:$0xff] %v2744_v5  ;;  %v1935_v12 = vmul.f32 %v3243_v53, %v5235_v9  ;;  %v1936_v16 = vmul.f32 %v3243_v53, %v5236_v52  ;;  %v1937_v43 = vmul.f32 %v3243_v53, %v5237_v10  ;;  %v1938_v55 = vmul.f32 %v3243_v53, %v5238_v26  ;;  %v5251_v9 = vld [vmem:[#allocation43_spill] sm:$0xff]  ;;  %v5252_v52 = vld [vmem:[#allocation44_spill] sm:$0xff]  ;;  %v5253_v10 = vld [vmem:[#allocation42_spill] sm:$0xff] }
 0x34d   : > { %2418 = vst [vmem:[%s4576_s30 + $0xd8] sm:$0xff] %v2745_v44  ;;  %3248 = vrcp.f32 %v1744_v31  ;;  %v5254_v26 = vld [vmem:[#allocation45_spill] sm:$0xff] }
 0x34e   : > { %v2746_v63 = vpack.c.bf16 %v1936_v16, %v1935_v12  ;;  %v2747_v47 = vpack.c.bf16 %v1938_v55, %v1937_v43 }
 0x34f   : > { %v3245_v22 = vpop.eup %3244 }
 0x350   : > { %2419 = vst [vmem:[%s4576_s30 + $0xe0] sm:$0xff] %v2746_v63  ;;  %2420 = vst [vmem:[%s4576_s30 + $0xe8] sm:$0xff] %v2747_v47  ;;  %v1939_v21 = vmul.f32 %v3245_v22, %v5239_v4  ;;  %v1940_v59 = vmul.f32 %v3245_v22, %v5240_v60  ;;  %v1941_v28 = vmul.f32 %v3245_v22, %v5241_v30  ;;  %v1749_v25 = vpop.xlane.xlu0 %1748  ;;  %v5255_v4 = vld [vmem:[#allocation47_spill] sm:$0xff]  ;;  %v5256_v60 = vld [vmem:[#allocation48_spill] sm:$0xff] }
 0x351   : > { %v1942_v48 = vmul.f32 %v3245_v22, %v5242_v7  ;;  %3250 = vrcp.f32 %v1749_v25  ;;  %v5257_v30 = vld [vmem:[#allocation46_spill] sm:$0xff]  ;;  %v5258_v7 = vld [vmem:[#allocation49_spill] sm:$0xff] }
 0x352   : > { %v2748_v46 = vpack.c.bf16 %v1940_v59, %v1939_v21 }
 0x353   : > { %v2749_v50 = vpack.c.bf16 %v1942_v48, %v1941_v28  ;;  %v3247_v49 = vpop.eup %3246  ;;  %v1754_v11 = vpop.xlane.xlu1 %1753 }
 0x354   : > { %2421 = vst [vmem:[%s4576_s30 + $0xf0] sm:$0xff] %v2748_v46  ;;  %v1943_v41 = vmul.f32 %v3247_v49, %v5243_v34  ;;  %v1944_v42 = vmul.f32 %v3247_v49, %v5244_v13  ;;  %v1945_v24 = vmul.f32 %v3247_v49, %v5245_v19  ;;  %v1946_v39 = vmul.f32 %v3247_v49, %v5246_v18  ;;  %v5259_v34 = vld [vmem:[#allocation51_spill] sm:$0xff]  ;;  %v5260_v13 = vld [vmem:[#allocation52_spill] sm:$0xff]  ;;  %v5261_v19 = vld [vmem:[#allocation50_spill] sm:$0xff] }
 0x355   : > { %2422 = vst [vmem:[%s4576_s30 + $0xf8] sm:$0xff] %v2749_v50  ;;  %3252 = vrcp.f32 %v1754_v11  ;;  %v5262_v18 = vld [vmem:[#allocation53_spill] sm:$0xff] }
 0x356   : > { %v2750_v38 = vpack.c.bf16 %v1944_v42, %v1943_v41  ;;  %v2751_v33 = vpack.c.bf16 %v1946_v39, %v1945_v24 }
 0x357   : > { %v3249_v14 = vpop.eup %3248 }
 0x358   : > { %2423 = vst [vmem:[%s4576_s30 + $0x100] sm:$0xff] %v2750_v38  ;;  %2424 = vst [vmem:[%s4576_s30 + $0x108] sm:$0xff] %v2751_v33  ;;  %v1947_v17 = vmul.f32 %v3249_v14, %v5247_v3  ;;  %v1948_v36 = vmul.f32 %v3249_v14, %v5248_v56  ;;  %v1949_v32 = vmul.f32 %v3249_v14, %v5249_v27  ;;  %v1759_v61 = vpop.xlane.xlu0 %1758  ;;  %v5263_v3 = vld [vmem:[#allocation55_spill] sm:$0xff]  ;;  %v5264_v56 = vld [vmem:[#allocation56_spill] sm:$0xff] }
 0x359   : > { %v1950_v2 = vmul.f32 %v3249_v14, %v5250_v8  ;;  %3254 = vrcp.f32 %v1759_v61  ;;  %v5265_v27 = vld [vmem:[#allocation54_spill] sm:$0xff]  ;;  %v5266_v8 = vld [vmem:[#allocation57_spill] sm:$0xff] }
 0x35a   : > { %v2752_v5 = vpack.c.bf16 %v1948_v36, %v1947_v17 }
 0x35b   : > { %v2753_v44 = vpack.c.bf16 %v1950_v2, %v1949_v32  ;;  %v3251_v53 = vpop.eup %3250  ;;  %v1764_v31 = vpop.xlane.xlu1 %1763 }
 0x35c   : > { %2425 = vst [vmem:[%s4576_s30 + $0x110] sm:$0xff] %v2752_v5  ;;  %v1951_v12 = vmul.f32 %v3251_v53, %v5251_v9  ;;  %v1952_v16 = vmul.f32 %v3251_v53, %v5252_v52  ;;  %v1953_v43 = vmul.f32 %v3251_v53, %v5253_v10  ;;  %v1954_v55 = vmul.f32 %v3251_v53, %v5254_v26  ;;  %v5267_v9 = vld [vmem:[#allocation59_spill] sm:$0xff]  ;;  %v5268_v52 = vld [vmem:[#allocation60_spill] sm:$0xff]  ;;  %v5269_v10 = vld [vmem:[#allocation58_spill] sm:$0xff] }
 0x35d   : > { %2426 = vst [vmem:[%s4576_s30 + $0x118] sm:$0xff] %v2753_v44  ;;  %3256 = vrcp.f32 %v1764_v31  ;;  %v5270_v26 = vld [vmem:[#allocation61_spill] sm:$0xff] }
 0x35e   : > { %v2754_v63 = vpack.c.bf16 %v1952_v16, %v1951_v12  ;;  %v2755_v47 = vpack.c.bf16 %v1954_v55, %v1953_v43 }
 0x35f   : > { %v3253_v22 = vpop.eup %3252 }
 0x360   : > { %2427 = vst [vmem:[%s4576_s30 + $0x120] sm:$0xff] %v2754_v63  ;;  %2428 = vst [vmem:[%s4576_s30 + $0x128] sm:$0xff] %v2755_v47  ;;  %v1955_v21 = vmul.f32 %v3253_v22, %v5255_v4  ;;  %v1956_v59 = vmul.f32 %v3253_v22, %v5256_v60  ;;  %v1957_v28 = vmul.f32 %v3253_v22, %v5257_v30  ;;  %v1769_v25 = vpop.xlane.xlu0 %1768  ;;  %v5271_v4 = vld [vmem:[#allocation63_spill] sm:$0xff]  ;;  %v5272_v60 = vld [vmem:[#allocation64_spill] sm:$0xff] }
 0x361   : > { %v1958_v48 = vmul.f32 %v3253_v22, %v5258_v7  ;;  %3258 = vrcp.f32 %v1769_v25  ;;  %v5273_v30 = vld [vmem:[#allocation62_spill] sm:$0xff]  ;;  %v5274_v7 = vld [vmem:[#allocation65_spill] sm:$0xff] }
 0x362   : > { %v2756_v46 = vpack.c.bf16 %v1956_v59, %v1955_v21 }
 0x363   : > { %v2757_v50 = vpack.c.bf16 %v1958_v48, %v1957_v28  ;;  %v3255_v49 = vpop.eup %3254  ;;  %v1774_v11 = vpop.xlane.xlu1 %1773 }
 0x364   : > { %2429 = vst [vmem:[%s4576_s30 + $0x130] sm:$0xff] %v2756_v46  ;;  %v1959_v41 = vmul.f32 %v3255_v49, %v5259_v34  ;;  %v1960_v42 = vmul.f32 %v3255_v49, %v5260_v13  ;;  %v1961_v24 = vmul.f32 %v3255_v49, %v5261_v19  ;;  %v1962_v39 = vmul.f32 %v3255_v49, %v5262_v18  ;;  %v5275_v34 = vld [vmem:[#allocation67_spill] sm:$0xff]  ;;  %v5276_v13 = vld [vmem:[#allocation68_spill] sm:$0xff] }
 0x365   : > { %2430 = vst [vmem:[%s4576_s30 + $0x138] sm:$0xff] %v2757_v50  ;;  %3260 = vrcp.f32 %v1774_v11 }
 0x366   : > { %v2758_v38 = vpack.c.bf16 %v1960_v42, %v1959_v41  ;;  %v2759_v33 = vpack.c.bf16 %v1962_v39, %v1961_v24 }
 0x367   : > { %v3257_v14 = vpop.eup %3256 }
 0x368   : > { %2431 = vst [vmem:[%s4576_s30 + $0x140] sm:$0xff] %v2758_v38  ;;  %2432 = vst [vmem:[%s4576_s30 + $0x148] sm:$0xff] %v2759_v33  ;;  %v1963_v17 = vmul.f32 %v3257_v14, %v5263_v3  ;;  %v1964_v36 = vmul.f32 %v3257_v14, %v5264_v56  ;;  %v1965_v32 = vmul.f32 %v3257_v14, %v5265_v27  ;;  %v1779_v61 = vpop.xlane.xlu0 %1778 }
 0x369   : > { %v1966_v2 = vmul.f32 %v3257_v14, %v5266_v8  ;;  %3262 = vrcp.f32 %v1779_v61  ;;  %v5277_v14 = vld [vmem:[#allocation66_spill] sm:$0xff]  ;;  %v5280_v61 = vld [vmem:[#allocation72_spill] sm:$0xff] }
 0x36a   : > { %v2760_v5 = vpack.c.bf16 %v1964_v36, %v1963_v17  ;;  %v5278_v17 = vld [vmem:[#allocation69_spill] sm:$0xff]  ;;  %v5279_v36 = vld [vmem:[#allocation71_spill] sm:$0xff] }
 0x36b   : > { %v2761_v44 = vpack.c.bf16 %v1966_v2, %v1965_v32  ;;  %v3259_v53 = vpop.eup %3258  ;;  %v1784_v31 = vpop.xlane.xlu1 %1783 }
 0x36c   : > { %2433 = vst [vmem:[%s4576_s30 + $0x150] sm:$0xff] %v2760_v5  ;;  %v1967_v12 = vmul.f32 %v3259_v53, %v5267_v9  ;;  %v1968_v16 = vmul.f32 %v3259_v53, %v5268_v52  ;;  %v1969_v43 = vmul.f32 %v3259_v53, %v5269_v10  ;;  %v1970_v55 = vmul.f32 %v3259_v53, %v5270_v26 }
 0x36d   : > { %2434 = vst [vmem:[%s4576_s30 + $0x158] sm:$0xff] %v2761_v44  ;;  %3264 = vrcp.f32 %v1784_v31  ;;  %v5281_v44 = vld [vmem:[#allocation70_spill] sm:$0xff] }
 0x36e   : > { %v2762_v63 = vpack.c.bf16 %v1968_v16, %v1967_v12  ;;  %v2763_v47 = vpack.c.bf16 %v1970_v55, %v1969_v43 }
 0x36f   : > { %v3261_v22 = vpop.eup %3260 }
 0x370   : > { %2435 = vst [vmem:[%s4576_s30 + $0x160] sm:$0xff] %v2762_v63  ;;  %2436 = vst [vmem:[%s4576_s30 + $0x168] sm:$0xff] %v2763_v47  ;;  %v1971_v21 = vmul.f32 %v3261_v22, %v5271_v4  ;;  %v1972_v59 = vmul.f32 %v3261_v22, %v5272_v60  ;;  %v1973_v28 = vmul.f32 %v3261_v22, %v5273_v30  ;;  %v1789_v25 = vpop.xlane.xlu0 %1788 }
 0x371   : > { %v1974_v48 = vmul.f32 %v3261_v22, %v5274_v7  ;;  %3266 = vrcp.f32 %v1789_v25  ;;  %v5283_v7 = vld [vmem:[#allocation75_spill] sm:$0xff]  ;;  %v5284_v25 = vld [vmem:[#allocation76_spill] sm:$0xff] }
 0x372   : > { %v2764_v46 = vpack.c.bf16 %v1972_v59, %v1971_v21 }
 0x373   : > { %v2765_v50 = vpack.c.bf16 %v1974_v48, %v1973_v28  ;;  %v3263_v49 = vpop.eup %3262  ;;  %v1794_v11 = vpop.xlane.xlu1 %1793 }
 0x374   : > { %2437 = vst [vmem:[%s4576_s30 + $0x170] sm:$0xff] %v2764_v46  ;;  %v1975_v41 = vmul.f32 %v3263_v49, %v5275_v34  ;;  %v1976_v42 = vmul.f32 %v3263_v49, %v5276_v13  ;;  %v1977_v19 = vmul.f32 %v3263_v49, %v4456_v1  ;;  %v1978_v24 = vmul.f32 %v3263_v49, %v4461_v35  ;;  %v5285_v46 = vld [vmem:[#allocation74_spill] sm:$0xff] }
 0x375   : > { %2438 = vst [vmem:[%s4576_s30 + $0x178] sm:$0xff] %v2765_v50  ;;  %3268 = vrcp.f32 %v1794_v11 }
 0x376   : > { %v2766_v18 = vpack.c.bf16 %v1976_v42, %v1975_v41  ;;  %v2767_v39 = vpack.c.bf16 %v1978_v24, %v1977_v19  ;;  %v1799_v38 = vpop.xlane.xlu0 %1798  ;;  %v5287_v41 = vld [vmem:[#allocation79_spill] sm:$0xff]  ;;  %v5288_v42 = vld [vmem:[#allocation80_spill] sm:$0xff]  ;;  %v5289_v24 = vld [vmem:[#allocation78_spill] sm:$0xff] }
 0x377   : > { %v3265_v33 = vpop.eup %3264  ;;  %3270 = vrcp.f32 %v1799_v38 }
 0x378   : > { %2439 = vst [vmem:[%s4576_s30 + $0x180] sm:$0xff] %v2766_v18  ;;  %2440 = vst [vmem:[%s4576_s30 + $0x188] sm:$0xff] %v2767_v39  ;;  %v1979_v3 = vmul.f32 %v3265_v33, %v5277_v14  ;;  %v1980_v56 = vmul.f32 %v3265_v33, %v5278_v17  ;;  %v1981_v27 = vmul.f32 %v3265_v33, %v5279_v36  ;;  %v5290_v39 = vld [vmem:[#allocation81_spill] sm:$0xff] }
 0x379   : > { %v1982_v1 = vmul.f32 %v3265_v33, %v4478_v23 }
 0x37a   : > { %v2768_v32 = vpack.c.bf16 %v1980_v56, %v1979_v3  ;;  %v1804_v8 = vpop.xlane.xlu1 %1803 }
 0x37b   : > { %v2769_v35 = vpack.c.bf16 %v1982_v1, %v1981_v27  ;;  %v3267_v2 = vpop.eup %3266  ;;  %3272 = vrcp.f32 %v1804_v8 }
 0x37c   : > { %2441 = vst [vmem:[%s4576_s30 + $0x190] sm:$0xff] %v2768_v32  ;;  %v1983_v5 = vmul.f32 %v3267_v2, %v5280_v61  ;;  %v1984_v53 = vmul.f32 %v3267_v2, %v5281_v44  ;;  %v1985_v31 = vmul.f32 %v3267_v2, %v4488_v45  ;;  %v1986_v9 = vmul.f32 %v3267_v2, %v4493_v0 }
 0x37d   : > { %2442 = vst [vmem:[%s4576_s30 + $0x198] sm:$0xff] %v2769_v35 }
 0x37e   : > { %v2770_v12 = vpack.c.bf16 %v1984_v53, %v1983_v5  ;;  %v2771_v52 = vpack.c.bf16 %v1986_v9, %v1985_v31  ;;  %v1809_v23 = vpop.xlane.xlu0 %1808 }
 0x37f   : > { %v3269_v16 = vpop.eup %3268  ;;  %3274 = vrcp.f32 %v1809_v23 }
 0x380   : > { %2443 = vst [vmem:[%s4576_s30 + $0x1a0] sm:$0xff] %v2770_v12  ;;  %2444 = vst [vmem:[%s4576_s30 + $0x1a8] sm:$0xff] %v2771_v52  ;;  %v1987_v10 = vmul.f32 %v3269_v16, %v4499_v57  ;;  %v1988_v43 = vmul.f32 %v3269_v16, %v4501_v29  ;;  %v1989_v26 = vmul.f32 %v3269_v16, %v4505_v58 }
 0x381   : > { %v1990_v45 = vmul.f32 %v3269_v16, %v4510_v6  ;;  %v3271_v55 = vpop.eup %3270 }
 0x382   : > { %v2772_v0 = vpack.c.bf16 %v1988_v43, %v1987_v10  ;;  %v1991_v47 = vmul.f32 %v3271_v55, %v4514_v15  ;;  %v1992_v22 = vmul.f32 %v3271_v55, %v4517_v62  ;;  %v1814_v4 = vpop.xlane.xlu1 %1813  ;;  %v1993_v21 = vmul.f32 %v3271_v55, %v4520_v51  ;;  %v5282_v51 = vld [vmem:[#allocation73_spill] sm:$0xff] }
 0x383   : > { %v2773_v63 = vpack.c.bf16 %v1990_v45, %v1989_v26  ;;  %v1994_v57 = vmul.f32 %v3271_v55, %v4524_v40  ;;  %3276 = vrcp.f32 %v1814_v4 }
 0x384   : > { %2445 = vst [vmem:[%s4576_s30 + $0x1b0] sm:$0xff] %v2772_v0  ;;  %v2774_v29 = vpack.c.bf16 %v1992_v22, %v1991_v47 }
 0x385   : > { %2446 = vst [vmem:[%s4576_s30 + $0x1b8] sm:$0xff] %v2773_v63  ;;  %v3273_v58 = vpop.eup %3272  ;;  %v2775_v6 = vpack.c.bf16 %v1994_v57, %v1993_v21 }
 0x386   : > { %2447 = vst [vmem:[%s4576_s30 + $0x1c0] sm:$0xff] %v2774_v29  ;;  %v1995_v60 = vmul.f32 %v3273_v58, %v4527_v20  ;;  %v1996_v15 = vmul.f32 %v3273_v58, %v4530_v37  ;;  %v1997_v62 = vmul.f32 %v3273_v58, %v4532_v54  ;;  %v1998_v59 = vmul.f32 %v3273_v58, %v5282_v51  ;;  %v5286_v37 = vld [vmem:[#allocation77_spill] sm:$0xff] }
 0x387   : > { %2448 = vst [vmem:[%s4576_s30 + $0x1c8] sm:$0xff] %v2775_v6 }
 0x388   : > { %v2776_v40 = vpack.c.bf16 %v1996_v15, %v1995_v60  ;;  %v2777_v30 = vpack.c.bf16 %v1998_v59, %v1997_v62 }
 0x389   : > { %v3275_v28 = vpop.eup %3274 }
 0x38a   : > { %2449 = vst [vmem:[%s4576_s30 + $0x1d0] sm:$0xff] %v2776_v40  ;;  %2450 = vst [vmem:[%s4576_s30 + $0x1d8] sm:$0xff] %v2777_v30  ;;  %v1999_v48 = vmul.f32 %v3275_v28, %v5283_v7  ;;  %v2000_v20 = vmul.f32 %v3275_v28, %v5284_v25  ;;  %v2001_v50 = vmul.f32 %v3275_v28, %v5285_v46 }
 0x38b   : > { %v2002_v49 = vmul.f32 %v3275_v28, %v5286_v37 }
 0x38c   : > { %v2778_v54 = vpack.c.bf16 %v2000_v20, %v1999_v48 }
 0x38d   : > { %v2779_v11 = vpack.c.bf16 %v2002_v49, %v2001_v50  ;;  %v3277_v34 = vpop.eup %3276 }
 0x38e   : > { %2451 = vst [vmem:[%s4576_s30 + $0x1e0] sm:$0xff] %v2778_v54  ;;  %v2003_v13 = vmul.f32 %v3277_v34, %v5287_v41  ;;  %v2004_v19 = vmul.f32 %v3277_v34, %v5288_v42  ;;  %v2005_v18 = vmul.f32 %v3277_v34, %v5289_v24  ;;  %v2006_v38 = vmul.f32 %v3277_v34, %v5290_v39 }
 0x38f   : > { %2452 = vst [vmem:[%s4576_s30 + $0x1e8] sm:$0xff] %v2779_v11 }
 0x390   : > { %v2780_v33 = vpack.c.bf16 %v2004_v19, %v2003_v13  ;;  %v2781_v14 = vpack.c.bf16 %v2006_v38, %v2005_v18 }
 0x392   : > { %2453 = vst [vmem:[%s4576_s30 + $0x1f0] sm:$0xff] %v2780_v33  ;;  %2454 = vst [vmem:[%s4576_s30 + $0x1f8] sm:$0xff] %v2781_v14 }
 0x393   : > { %3291 = shalt.err (!%p3288_p5)
}
 0x394   : > { %s3292_s14 = scalar_lea.hbm %s4765_s9, 8192  ;;  %s3296_s26 = scalar_lea.hbm %s4823_s4, 16384 }
 0x395   : > { %p3293_p6 = scmp.ne.s32.totalorder %s4765_s9, %s3292_s14  ;;  %p3297_p10 = scmp.lt.u32.totalorder %s4765_s9, %s4823_s4 }
 0x396   : > { %p3298_p11 = scmp.lt.u32.totalorder %s3296_s26, %s3292_s14  ;;  %p3300_p13 = scmp.lt.u32.totalorder %s3292_s14, %s4765_s9 }
 0x397   : > { %p3294_p7 = pnand %p3293_p6, %p3427_p4 }
 0x398   : > { %p3299_p12 = por %p3298_p11, %p3297_p10 }
 0x399   : > { %p3295_p9 = pneg %p3294_p7 }
 0x39a   : > { %p3301_p0 = por %p3300_p13, %p3299_p12 }
 0x39c   : > { %p3302_p1 = pnand %p3301_p0, %p3295_p9 }
 0x39e   : > { %3305 = shalt.err (!%p3302_p1)
}
 0x39f   : > { %s3360_s30 = smov 256   ;;  %s3361_s5 = smov 16  }
 0x3a0   : > { %2888 = dma.vmem_to_hbm [thread:$0]  (%p3427_p4), %s4767_s6, 8192, %s4765_s9, %s4773_s18, %s3360_s30, %s3360_s30, %s3361_s5  }
 0x3a1 PF: > { %p2894_p2 = scmp.ge.s32.totalorder %s3356_s20, 2  ;;  %s2487_s7 = sand.u32 1, %s3336_s15  }
 0x3a2   : > { %s2488_s8 = scalar_lea.sflag [#allocation3], %s2487_s7 }
 0x3a3   : > { %p2891_p3 = pnand %p2894_p2, %p3434_p8 }
 0x3a5   : > { %3331 = dma.done.wait (!%p2891_p3), %s2488_s8, 8192  }
 0x3a6   : > { %3333 = vsyncadd (!%p2891_p3), %s2488_s8, 4294959104  ;;  %s17_s20 = sadd.s32 1, %s3356_s20   ;;  %s5291_s15 = smov %s3340_s16 }
 0x3a7   : > { %p14_p5 = scmp.ge.s32.totalorder %s17_s20, 4   ;;  %s5292_s16 = smov %s3344_s17 }
 0x3a8   : > { %s5293_s17 = smov %s3440_s28  ;;  %s5294_s18 = smov %s3352_s19 }
 0x3a9   : > { %s5295_s19 = smov %s5297_s23  ;;  %16 = sbr.rel (!%p14_p5) target bundleno = 4 (0x4), region = 74 }
 0x3b0   :  { %2493 = vsyncpa [#allocation3], 1 }
 0x3b1   :  { %2495 = vsyncpa [#allocation3 + $0x1], 1 }

</bundles_post_ra>
